<compile_context>
chip_gen: v7x
topology: tpu7x:2x2x1
jax: 0.10.0
libtpu: 0.0.40
codegen_flags: <defaults>
</compile_context>

<pallas_src>
import jax
import jax.numpy as jnp
from jax.experimental import pallas as pl
from jax.experimental.pallas import tpu as pltpu


def relu_conv1x1_kernel(x_ref, w_ref, o_ref):
    # x_ref: (Cin, HW)      activations for one batch element (full block)
    # w_ref: (Cout_blk, Cin) slice of the 1x1 conv weight
    # o_ref: (Cout_blk, HW)  corresponding output slice
    x = jnp.maximum(x_ref[...], 0.0)  # fused ReLU (inplace relu19)
    o_ref[...] = jnp.dot(
        w_ref[...], x, preferred_element_type=jnp.float32
    ).astype(o_ref.dtype)


def relu_conv1x1(x_nchw, weight_oihw):
    """x_nchw: (N, Cin, H, W) float32; weight_oihw: (Cout, Cin, 1, 1) float32."""
    N, Cin, H, W = x_nchw.shape
    Cout = weight_oihw.shape[0]
    HW = H * W

    # Pure reshapes on contiguous data — no transposes, no extra HBM passes.
    x_flat = x_nchw.reshape(N, Cin, HW)      # (N, Cin, HW)
    w = weight_oihw.reshape(Cout, Cin)       # (Cout, Cin)

    # Split Cout into (up to) 2 sublane-aligned blocks so the grid has a
    # second "parallel" axis for v7x megacore sharding.  Fall back to a
    # single block if Cout can't be split cleanly.
    if Cout % 2 == 0 and (Cout // 2) % 8 == 0:
        n_out_blocks = 2
    else:
        n_out_blocks = 1
    cout_blk = Cout // n_out_blocks

    out_flat = pl.pallas_call(
        relu_conv1x1_kernel,
        out_shape=jax.ShapeDtypeStruct((N, Cout, HW), x_flat.dtype),
        grid_spec=pltpu.PrefetchScalarGridSpec(
            num_scalar_prefetch=0,
            grid=(N, n_out_blocks),
            in_specs=[
                # Batch dim squeezed; full (Cin, HW) activation block.  Same
                # block index for every j -> fetched once per batch element.
                pl.BlockSpec((None, Cin, HW), lambda n, j: (n, 0, 0)),
                # Per-step (Cout_blk, Cin) weight slice.
                pl.BlockSpec((cout_blk, Cin), lambda n, j: (j, 0)),
            ],
            out_specs=pl.BlockSpec((None, cout_blk, HW), lambda n, j: (n, j, 0)),
        ),
        compiler_params=pltpu.CompilerParams(
            # Both axes are independent -> shardable across TensorCores (v7x).
            dimension_semantics=("parallel", "parallel"),
            # ~2.6 MB double-buffered working set; explicit generous budget.
            vmem_limit_bytes=32 * 1024 * 1024,
        ),
    )(x_flat, w)

    # (N, Cout, HW) -> (N, Cout, H, W): a free reshape, no transpose.
    return out_flat.reshape(N, Cout, H, W)


if __name__ == "__main__":
    key = jax.random.PRNGKey(0)
    kx, kw = jax.random.split(key)

    # Shapes implied by the module: x73 = randn(1, 128, 28, 28),
    # Conv2d(128, 512, kernel_size=1, stride=1, bias=False)
    N, Cin, H, W, Cout = 1, 128, 28, 28, 512

    x = jax.random.normal(kx, (N, Cin, H, W), dtype=jnp.float32)
    # Deterministic weight init (kaiming-uniform-ish scale, fan_in = Cin*1*1)
    bound = 1.0 / (Cin ** 0.5)
    weight = jax.random.uniform(
        kw, (Cout, Cin, 1, 1), dtype=jnp.float32, minval=-bound, maxval=bound
    )

    out = relu_conv1x1(x, weight)
    out = jax.block_until_ready(out)

    # Sanity check against a plain-JAX reference of relu -> 1x1 conv.
    ref = jnp.einsum(
        "nchw,oc->nohw", jnp.maximum(x, 0.0), weight.reshape(Cout, Cin)
    )
    assert out.shape == (N, Cout, H, W), out.shape
    assert jnp.allclose(out, ref, atol=1e-4, rtol=1e-4)

    print("KERNEL_OK")
</pallas_src>

<mosaic_0001>
module attributes {stable_mosaic.version = 11 : i64} {
  func.func @relu_conv1x1_kernel(%arg0: i32, %arg1: i32, %arg2: memref<1x128x784xf32, #tpu.memory_space<vmem>>, %arg3: memref<256x128xf32, #tpu.memory_space<vmem>>, %arg4: memref<1x256x784xf32, #tpu.memory_space<vmem>>) attributes {dimension_semantics = [#tpu.dimension_semantics<parallel>, #tpu.dimension_semantics<parallel>], iteration_bounds = array<i64: 1, 2>, scalar_prefetch = 0 : i64, scratch_operands = 0 : i64, tpu.core_type = #tpu.core_type<tc>, window_params = [{transform_indices = @transform_0, window_bounds = array<i64: 1, 128, 784>}, {transform_indices = @transform_1, window_bounds = array<i64: 256, 128>}, {transform_indices = @transform_2, window_bounds = array<i64: 1, 256, 784>}]} {
    %c0 = arith.constant 0 : index
    %c0_0 = arith.constant 0 : index
    %c0_1 = arith.constant 0 : index
    %0 = vector.load %arg2[%c0, %c0_0, %c0_1] : memref<1x128x784xf32, #tpu.memory_space<vmem>>, vector<1x128x784xf32>
    %1 = vector.shape_cast %0 : vector<1x128x784xf32> to vector<128x784xf32>
    %cst = arith.constant 0.000000e+00 : f32
    %2 = vector.broadcast %cst : f32 to vector<128x784xf32>
    %3 = arith.maximumf %1, %2 : vector<128x784xf32>
    %c0_2 = arith.constant 0 : index
    %c0_3 = arith.constant 0 : index
    %4 = vector.load %arg3[%c0_2, %c0_3] : memref<256x128xf32, #tpu.memory_space<vmem>>, vector<256x128xf32>
    %cst_4 = arith.constant dense<0.000000e+00> : vector<256x784xf32>
    %5 = tpu.matmul %4, %3, %cst_4 {dimension_numbers = #tpu.dot_dimension_numbers<[1], [0], [0], [1], [0, 0, 1, 1], [], []>} : vector<256x128xf32>, vector<128x784xf32>, vector<256x784xf32> -> vector<256x784xf32>
    %c0_5 = arith.constant 0 : index
    %c0_6 = arith.constant 0 : index
    %c0_7 = arith.constant 0 : index
    %6 = vector.load %arg4[%c0_5, %c0_6, %c0_7] : memref<1x256x784xf32, #tpu.memory_space<vmem>>, vector<1x256x784xf32>
    %7 = vector.shape_cast %6 : vector<1x256x784xf32> to vector<256x784xf32>
    %8 = vector.shape_cast %5 : vector<256x784xf32> to vector<1x256x784xf32>
    tpu.vector_store %arg4[%c0_5, %c0_6, %c0_7], %8 {strides = array<i32>} : memref<1x256x784xf32, #tpu.memory_space<vmem>>, vector<1x256x784xf32>,
    return
  }
  func.func @transform_0(%arg0: i32, %arg1: i32) -> (i32, i32, i32) {
    %c0_i32 = arith.constant 0 : i32
    %c0_i32_0 = arith.constant 0 : i32
    %c0_i32_1 = arith.constant 0 : i32
    return %arg0, %c0_i32, %c0_i32_0 : i32, i32, i32
  }
  func.func @transform_1(%arg0: i32, %arg1: i32) -> (i32, i32) {
    %c0_i32 = arith.constant 0 : i32
    %c0_i32_0 = arith.constant 0 : i32
    return %arg1, %c0_i32 : i32, i32
  }
  func.func @transform_2(%arg0: i32, %arg1: i32) -> (i32, i32, i32) {
    %c0_i32 = arith.constant 0 : i32
    %c0_i32_0 = arith.constant 0 : i32
    return %arg0, %arg1, %c0_i32 : i32, i32, i32
  }
}

</mosaic_0001>

<bundles_post_ra>
// kernel: tpu_custom_call.1
= control target key start
LH: loop header
LB: loop body
LE: loop exit
PB: predicated region body
PF: predicated region fallthrough
CT: control target
= control target key end

     0   :  { %7 = vsyncpa [#allocation3], 0  ;;  %s3286_s0 = inlined_call_operand.vmem [shape: f32[1,128,784], index: 0, kind: input, shape index: {}]   ;;  %s3287_s1 = inlined_call_operand.hbm [shape: f32[512,128], index: 1, kind: input, shape index: {}]   ;;  %s3288_s2 = inlined_call_operand.vmem [shape: f32[1,512,784], index: 2, kind: output, shape index: {}]  }
   0x1   :  { %9 = vsyncpa [#allocation3 + $0x1], 0  ;;  %s2247_s9 = smov 0   ;;  %s2249_s10 = smov 0  }
   0x2   :  { %s2251_s11 = smov 0   ;;  %s2253_s12 = smov 0  }
   0x3   :  { %s2255_s13 = smov 0   ;;  %s2257_s14 = smov 0  }
   0x4 LB: > { %s1800_s15 = sadd.s32 4294967295, %s2226_s14   ;;  %s24_s16 = sadd.s32 1, %s2222_s13  ;;  %s2226_s14 = sphi %s2257_s14, %s15_s14   ;;  %s2222_s13 = sphi %s2255_s13, %s3296_s13   ;;  %s2218_s12 = sphi %s2253_s12, %s3295_s12   ;;  %s2214_s11 = sphi %s2251_s11, %s3294_s11   ;;  %s2210_s10 = sphi %s2249_s10, %s3293_s10   ;;  %s2206_s9 = sphi %s2247_s9, %s3292_s9  }
   0x5   : > { %p25_p0 = scmp.ge.s32.totalorder %s24_s16, 2  ;;  %s60_s17 = sadd.s32 1, %s2214_s11 }
   0x6   : > { %p67_p1 = scmp.ne.s32.totalorder %s2214_s11, %s2210_s10  ;;  %p68_p2 = scmp.eq.s32.totalorder %s2226_s14, 0 }
   0x7   : > { %s3298_s16 = smov (%p25_p0, %s24_s16), 0  ;;  %p73_p4 = scmp.ne.s32.totalorder %s2210_s10, %s2206_s9 }
   0x8   : > { %p2283_p3 = por %p68_p2, %p67_p1  ;;  %s57_s19 = ssub.s32 %s2222_s13, %s3298_s16 }
   0x9   : > { %p74_p5 = scmp.eq.s32.totalorder %s1800_s15, 0  ;;  %p58_p6 = scmp.eq.s32.totalorder %s57_s19, 0 }
   0xa   : > { %p2094_p8 = scmp.lt.s32.totalorder %s2226_s14, 2  ;;  %s133_s22 = sand.u32 1, %s2214_s11  }
   0xb   : > { %p2290_p7 = por %p74_p5, %p73_p4  ;;  %s1814_s23 = sshll.u32 %s2222_s13, 12 }
   0xc   : > { %s2296_s21 = scalar_select %p58_p6, %s2214_s11, %s60_s17  }
   0xd   : > { %s1805_s24 = sshll.u32 %s133_s22, 8  ;;  %s2303_s27 = scalar_lea.hbm %s3287_s1, %s1814_s23 }
   0xe   : > { %s137_s28 = scalar_lea.vmem [#allocation2], %s1805_s24  ;;  %p2307_p9 = pnand %p2094_p8, %p2283_p3 }
   0xf   : > { %s144_s29 = sshll.u32 %s137_s28, 4  ;;  %s2313_s3 = scalar_lea.sflag [#allocation3], %s133_s22  ;;  %s2311_s29 = int_to_ptr.vmem [resolvable:$true] %s144_s29 }
  0x10   : > { %s2146_s4 = scalar_lea.hbm %s2303_s27, 4096  ;;  %p2148_p11 = pneg %p2307_p9 }
  0x11   : > { %p2147_p10 = scmp.ne.s32.totalorder %s2303_s27, %s2146_s4  ;;  %s2151_s7 = scalar_lea.hbm %s3287_s1, 8192 }
  0x12   : > { %p2152_p0 = scmp.lt.u32.totalorder %s2303_s27, %s3287_s1  ;;  %p2153_p1 = scmp.lt.u32.totalorder %s2151_s7, %s2146_s4 }
  0x13   : > { %p2149_p12 = pnand %p2148_p11, %p2147_p10  ;;  %p2155_p3 = scmp.lt.u32.totalorder %s2146_s4, %s2303_s27 }
  0x14   : > { %p2154_p2 = por %p2153_p1, %p2152_p0 }
  0x15   : > { %p2150_p13 = pneg %p2149_p12 }
  0x16   : > { %p2156_p4 = por %p2155_p3, %p2154_p2 }
  0x18   : > { %p2157_p5 = pnand %p2156_p4, %p2150_p13 }
  0x1a   : > { %2160 = shalt.err (!%p2157_p5)
}
  0x1b   : > { %s2161_s15 = scalar_lea.vmem %s2311_s29, 4096  ;;  %s2228_s17 = smov [#allocation2]  }
  0x1c   : > { %p2162_p6 = scmp.ne.s32.totalorder %s2311_s29, %s2161_s15  ;;  %s2166_s18 = sshll.u32 %s2228_s17, 4  ;;  %s2167_s18 = int_to_ptr.vmem [resolvable:$false] %s2166_s18 }
  0x1d   : > { %s2168_s19 = scalar_lea.vmem %s2167_s18, 8192  ;;  %p2169_p12 = scmp.lt.s32.totalorder %s2311_s29, %s2167_s18 }
  0x1e   : > { %p2164_p8 = pnand %p2162_p6, %p2148_p11  ;;  %p2170_p0 = scmp.lt.s32.totalorder %s2168_s19, %s2161_s15 }
  0x20   : > { %p2165_p10 = pneg %p2164_p8  ;;  %p2171_p1 = por %p2170_p0, %p2169_p12 }
  0x22   : > { %p2172_p2 = pnand %p2171_p1, %p2165_p10 }
  0x24   : > { %2175 = shalt.err (!%p2172_p2)
}
  0x25   : > { %s2229_s22 = smov 128   ;;  %s2230_s23 = smov 8  }
  0x26   : > { %2093 = dma.hbm_to_vmem [thread:$0]  (!%p2307_p9), %s2303_s27, 4096, %s2311_s29, %s2313_s3, %s2229_s22, %s2229_s22, %s2230_s23  }
  0x27   : > { %p1808_p11 = scmp.ge.s32.totalorder %s2226_s14, 1  ;;  %p152_p13 = scmp.lt.s32.totalorder %s2226_s14, 3 }
  0x29   : > { %p153_p3 = pnand %p1808_p11, %p152_p13 }
  0x2a   : > { %s158_s24 = sand.u32 (!%p153_p3), 1, %s2210_s10  }
  0x2b   : > { %156 = sbr.rel (%p153_p3) target bundleno = 522 (0x20a), region = 28  ;;  %s1809_s25 = sshll.u32 (!%p153_p3), %s158_s24, 8 }
  0x2c   : > { %s159_s26 = scalar_lea.sflag (!%p153_p3), [#allocation3], %s158_s24  ;;  %s2344_s28 = scalar_lea.vmem (!%p153_p3), [#allocation2], %s1809_s25 }
  0x32   : > { %2201 = dma.done.wait (%p2290_p7), %s159_s26, 4096  }
  0x33   : > { %2203 = vsyncadd (%p2290_p7), %s159_s26, 4294963200  ;;  %v2231_v0 = vmov 0.0   ;;  %v211_v1 = vld [vmem:[%s3286_s0 + $0x8] sm:$0xff]  ;;  %v218_v2 = vld [vmem:[%s3286_s0 + $0x40] sm:$0xff]  ;;  %vm1468_vm0 = vcmask 130048  }
  0x34   : > { %530 = vmatprep.mubr.f32.mxu0 %v2231_v0  ;;  %674 = vmatprep.mubr.f32.mxu1 %v2231_v0  ;;  %v210_v3 = vld [vmem:[%s3286_s0] sm:$0xff]  ;;  %v323_v4 = vmax.f32 %v211_v1, 0.0  ;;  %v330_v5 = vmax.f32 %v218_v2, 0.0  ;;  %v217_v6 = vld [vmem:[%s3286_s0 + $0x38] sm:$0xff]  ;;  %v232_v9 = vld [vmem:[%s3286_s0 + $0xb0] sm:$0xff] }
  0x35   : > { %v322_v7 = vmax.f32 %v210_v3, 0.0  ;;  %v225_v8 = vld [vmem:[%s3286_s0 + $0x78] sm:$0xff]  ;;  %v329_v10 = vmax.f32 %v217_v6, 0.0  ;;  %v344_v12 = vmax.f32 %v232_v9, 0.0  ;;  %v224_v13 = vld [vmem:[%s3286_s0 + $0x70] sm:$0xff]  ;;  %v231_v14 = vld [vmem:[%s3286_s0 + $0xa8] sm:$0xff] }
  0x36   : > { %v337_v11 = vmax.f32 %v225_v8, 0.0  ;;  %v239_v15 = vld [vmem:[%s3286_s0 + $0xe8] sm:$0xff]  ;;  %v1943_v16 = vpack.c.bf16 %v330_v5, %v323_v4  ;;  %v336_v17 = vmax.f32 %v224_v13, 0.0  ;;  %v343_v18 = vmax.f32 %v231_v14, 0.0  ;;  %v246_v19 = vld [vmem:[%s3286_s0 + $0x120] sm:$0xff]  ;;  %v245_v22 = vld [vmem:[%s3286_s0 + $0x118] sm:$0xff] }
  0x37   : > { %v351_v20 = vmax.f32 %v239_v15, 0.0  ;;  %v238_v21 = vld [vmem:[%s3286_s0 + $0xe0] sm:$0xff]  ;;  %v1945_v23 = vpack.c.bf16 %v329_v10, %v322_v7  ;;  %v358_v25 = vmax.f32 %v246_v19, 0.0  ;;  %v253_v26 = vld [vmem:[%s3286_s0 + $0x158] sm:$0xff]  ;;  %v260_v27 = vld [vmem:[%s3286_s0 + $0x190] sm:$0xff]  ;;  %v357_v30 = vmax.f32 %v245_v22, 0.0 }
  0x38   : > { %v1947_v24 = vpack.c.bf16 %v344_v12, %v337_v11  ;;  %1944 = vmatprep.subr.bf16.mxu0 %v1943_v16  ;;  %2071 = vmatprep.subr.bf16.mxu1 %v1943_v16  ;;  %v1949_v28 = vpack.c.bf16 %v343_v18, %v336_v17  ;;  %v350_v29 = vmax.f32 %v238_v21, 0.0  ;;  %v365_v32 = vmax.f32 %v253_v26, 0.0  ;;  %v252_v34 = vld [vmem:[%s3286_s0 + $0x150] sm:$0xff]  ;;  %v259_v35 = vld [vmem:[%s3286_s0 + $0x188] sm:$0xff]  ;;  %v274_v37 = vld [vmem:[%s3286_s0 + $0x200] sm:$0xff] }
  0x39   : > { %1946 = vmatpush1.bf16.msra.mxu0 %v1945_v23  ;;  %2079 = vmatpush1.bf16.msra.mxu1 %v1945_v23  ;;  %v1951_v31 = vpack.c.bf16 %v358_v25, %v351_v20  ;;  %v372_v33 = vmax.f32 %v260_v27, 0.0  ;;  %v267_v36 = vld [vmem:[%s3286_s0 + $0x1c8] sm:$0xff]  ;;  %v364_v39 = vmax.f32 %v252_v34, 0.0  ;;  %v371_v40 = vmax.f32 %v259_v35, 0.0  ;;  %v266_v44 = vld [vmem:[%s3286_s0 + $0x1c0] sm:$0xff]  ;;  %v273_v45 = vld [vmem:[%s3286_s0 + $0x1f8] sm:$0xff] }
  0x3a   : > { %1948 = vmatprep.subr.bf16.mxu0 %v1947_v24  ;;  %2072 = vmatprep.subr.bf16.mxu1 %v1947_v24  ;;  %v1953_v38 = vpack.c.bf16 %v357_v30, %v350_v29  ;;  %v379_v42 = vmax.f32 %v267_v36, 0.0  ;;  %v386_v43 = vmax.f32 %v274_v37, 0.0  ;;  %v281_v46 = vld [vmem:[%s3286_s0 + $0x238] sm:$0xff]  ;;  %v288_v47 = vld [vmem:[%s3286_s0 + $0x270] sm:$0xff]  ;;  %v378_v49 = vmax.f32 %v266_v44, 0.0  ;;  %v287_v55 = vld [vmem:[%s3286_s0 + $0x268] sm:$0xff] }
  0x3b   : > { %v1955_v41 = vpack.c.bf16 %v372_v33, %v365_v32  ;;  %v1957_v48 = vpack.c.bf16 %v371_v40, %v364_v39  ;;  %v385_v50 = vmax.f32 %v273_v45, 0.0  ;;  %v393_v52 = vmax.f32 %v281_v46, 0.0  ;;  %v280_v54 = vld [vmem:[%s3286_s0 + $0x230] sm:$0xff]  ;;  %v295_v56 = vld [vmem:[%s3286_s0 + $0x2a8] sm:$0xff]  ;;  %v302_v57 = vld [vmem:[%s3286_s0 + $0x2e0] sm:$0xff] }
  0x3c   : > { %v1959_v51 = vpack.c.bf16 %v386_v43, %v379_v42  ;;  %v400_v53 = vmax.f32 %v288_v47, 0.0  ;;  %v392_v59 = vmax.f32 %v280_v54, 0.0  ;;  %v399_v60 = vmax.f32 %v287_v55, 0.0  ;;  %v294_v1 = vld [vmem:[%s3286_s0 + $0x2a0] sm:$0xff]  ;;  %v301_v2 = vld [vmem:[%s3286_s0 + $0x2d8] sm:$0xff]  ;;  %v316_v4 = vld [vmem:[%s3286_s0 + $0x350] sm:$0xff] }
  0x3d   : > { %1950 = vmatpush1.bf16.msra.mxu0 %v1949_v28  ;;  %2080 = vmatpush1.bf16.msra.mxu1 %v1949_v28  ;;  %v1961_v58 = vpack.c.bf16 %v385_v50, %v378_v49  ;;  %v407_v62 = vmax.f32 %v295_v56, 0.0  ;;  %v414_v63 = vmax.f32 %v302_v57, 0.0  ;;  %v309_v3 = vld [vmem:[%s3286_s0 + $0x318] sm:$0xff]  ;;  %v406_v6 = vmax.f32 %v294_v1, 0.0  ;;  %v308_v8 = vld [vmem:[%s3286_s0 + $0x310] sm:$0xff]  ;;  %v315_v9 = vld [vmem:[%s3286_s0 + $0x348] sm:$0xff] }
  0x3e   : > { %1952 = vmatprep.subr.bf16.mxu0 %v1951_v31  ;;  %2073 = vmatprep.subr.bf16.mxu1 %v1951_v31  ;;  %v1963_v61 = vpack.c.bf16 %v400_v53, %v393_v52  ;;  %v1965_v5 = vpack.c.bf16 %v399_v60, %v392_v59  ;;  %v413_v7 = vmax.f32 %v301_v2, 0.0  ;;  %v421_v11 = vmax.f32 %v309_v3, 0.0  ;;  %v213_v13 = vld [vmem:[%s3286_s0 + $0x18] sm:$0xff]  ;;  %v220_v14 = vld [vmem:[%s3286_s0 + $0x50] sm:$0xff]  ;;  %v215_v15 = vld [vmem:[%s3286_s0 + $0x28] sm:$0xff] }
  0x3f   : > { %v1967_v10 = vpack.c.bf16 %v414_v63, %v407_v62  ;;  %v428_v12 = vmax.f32 %v316_v4, 0.0  ;;  %v222_v16 = vld [vmem:[%s3286_s0 + $0x60] sm:$0xff]  ;;  %v420_v17 = vmax.f32 %v308_v8, 0.0  ;;  %v427_v18 = vmax.f32 %v315_v9, 0.0  ;;  %v212_v21 = vld [vmem:[%s3286_s0 + $0x10] sm:$0xff]  ;;  %v219_v26 = vld [vmem:[%s3286_s0 + $0x48] sm:$0xff] }
  0x40   : > { %v1969_v19 = vpack.c.bf16 %v413_v7, %v406_v6  ;;  %v325_v20 = vmax.f32 %v213_v13, 0.0  ;;  %v332_v23 = vmax.f32 %v220_v14, 0.0  ;;  %v327_v24 = vmax.f32 %v215_v15, 0.0  ;;  %v214_v27 = vld [vmem:[%s3286_s0 + $0x20] sm:$0xff]  ;;  %v221_v28 = vld [vmem:[%s3286_s0 + $0x58] sm:$0xff]  ;;  %v227_v29 = vld [vmem:[%s3286_s0 + $0x88] sm:$0xff] }
  0x41   : > { %1954 = vmatpush1.bf16.msra.mxu0 %v1953_v38  ;;  %2081 = vmatpush1.bf16.msra.mxu1 %v1953_v38  ;;  %v1971_v22 = vpack.c.bf16 %v428_v12, %v421_v11  ;;  %v334_v25 = vmax.f32 %v222_v16, 0.0  ;;  %v1973_v30 = vpack.c.bf16 %v427_v18, %v420_v17  ;;  %v234_v31 = vld [vmem:[%s3286_s0 + $0xc0] sm:$0xff]  ;;  %v229_v32 = vld [vmem:[%s3286_s0 + $0x98] sm:$0xff]  ;;  %v236_v33 = vld [vmem:[%s3286_s0 + $0xd0] sm:$0xff]  ;;  %v324_v34 = vmax.f32 %v212_v21, 0.0 }
  0x42   : > { %1956 = vmatprep.subr.bf16.mxu0 %v1955_v41  ;;  %2074 = vmatprep.subr.bf16.mxu1 %v1955_v41  ;;  %v331_v35 = vmax.f32 %v219_v26, 0.0  ;;  %v326_v36 = vmax.f32 %v214_v27, 0.0  ;;  %v333_v37 = vmax.f32 %v221_v28, 0.0  ;;  %v1975_v38 = vpack.c.bf16 %v332_v23, %v325_v20  ;;  %v226_v40 = vld [vmem:[%s3286_s0 + $0x80] sm:$0xff]  ;;  %v233_v41 = vld [vmem:[%s3286_s0 + $0xb8] sm:$0xff]  ;;  %v248_v45 = vld [vmem:[%s3286_s0 + $0x130] sm:$0xff] }
  0x43   : > { %v2007_v39 = vpack.c.bf16 %v334_v25, %v327_v24  ;;  %v339_v42 = vmax.f32 %v227_v29, 0.0  ;;  %v346_v43 = vmax.f32 %v234_v31, 0.0  ;;  %v241_v44 = vld [vmem:[%s3286_s0 + $0xf8] sm:$0xff]  ;;  %v341_v46 = vmax.f32 %v229_v32, 0.0  ;;  %v235_v49 = vld [vmem:[%s3286_s0 + $0xc8] sm:$0xff]  ;;  %v2503_v50 = vld [vmem:[%s2344_s28] sm:$0xff] }
  0x44   : > { %v348_v47 = vmax.f32 %v236_v33, 0.0  ;;  %v1977_v52 = vpack.c.bf16 %v331_v35, %v324_v34  ;;  %v2009_v53 = vpack.c.bf16 %v333_v37, %v326_v36  ;;  %v338_v54 = vmax.f32 %v226_v40, 0.0  ;;  %v247_v59 = vld [vmem:[%s3286_s0 + $0x128] sm:$0xff]  ;;  %v262_v62 = vld [vmem:[%s3286_s0 + $0x1a0] sm:$0xff]  ;;  %v261_v14 = vld [vmem:[%s3286_s0 + $0x198] sm:$0xff] }
  0x45   : > { %1958 = vmatpush1.bf16.msra.mxu0 %v1957_v48  ;;  %2082 = vmatpush1.bf16.msra.mxu1 %v1957_v48  ;;  %v228_v48 = vld [vmem:[%s3286_s0 + $0x90] sm:$0xff]  ;;  %v345_v55 = vmax.f32 %v233_v41, 0.0  ;;  %v353_v56 = vmax.f32 %v241_v44, 0.0  ;;  %v360_v57 = vmax.f32 %v248_v45, 0.0  ;;  %v1979_v60 = vpack.c.bf16 %v346_v43, %v339_v42  ;;  %v243_v3 = vld [vmem:[%s3286_s0 + $0x108] sm:$0xff]  ;;  %v250_v4 = vld [vmem:[%s3286_s0 + $0x140] sm:$0xff] }
  0x46   : > { %1960 = vmatprep.subr.bf16.mxu0 %v1959_v51  ;;  %2075 = vmatprep.subr.bf16.mxu1 %v1959_v51  ;;  %v2506_v51 = vld [vmem:[%s2344_s28 + $0xc0] sm:$0xff]  ;;  %v2011_v63 = vpack.c.bf16 %v348_v47, %v341_v46  ;;  %v340_v1 = vmax.f32 %v228_v48, 0.0  ;;  %v347_v2 = vmax.f32 %v235_v49, 0.0  ;;  %v2532_v6 = vld [vmem:[%s2344_s28 + $0xc8] sm:$0xff]  ;;  %v359_v9 = vmax.f32 %v247_v59, 0.0  ;;  %v269_v16 = vld [vmem:[%s3286_s0 + $0x1d8] sm:$0xff] }
  0x47   : > { %v1981_v7 = vpack.c.bf16 %v345_v55, %v338_v54  ;;  %v374_v12 = vmax.f32 %v262_v62, 0.0  ;;  %v254_v13 = vld [vmem:[%s3286_s0 + $0x160] sm:$0xff]  ;;  %v276_v17 = vld [vmem:[%s3286_s0 + $0x210] sm:$0xff]  ;;  %v355_v18 = vmax.f32 %v243_v3, 0.0  ;;  %v249_v21 = vld [vmem:[%s3286_s0 + $0x138] sm:$0xff]  ;;  %v373_v26 = vmax.f32 %v261_v14, 0.0 }
  0x48   : > { %v2013_v15 = vpack.c.bf16 %v347_v2, %v340_v1  ;;  %v242_v20 = vld [vmem:[%s3286_s0 + $0x100] sm:$0xff]  ;;  %v2561_v23 = vld [vmem:[%s2344_s28 + $0xd0] sm:$0xff]  ;;  %v366_v25 = vmax.f32 %v254_v13, 0.0  ;;  %v381_v28 = vmax.f32 %v269_v16, 0.0  ;;  %v388_v29 = vmax.f32 %v276_v17, 0.0  ;;  %v275_v31 = vld [vmem:[%s3286_s0 + $0x208] sm:$0xff] }
  0x49   : > { %1962 = vmatpush1.bf16.msra.mxu0 %v1961_v58  ;;  %2083 = vmatpush1.bf16.msra.mxu1 %v1961_v58  ;;  %v240_v58 = vld [vmem:[%s3286_s0 + $0xf0] sm:$0xff]  ;;  %v283_v32 = vld [vmem:[%s3286_s0 + $0x248] sm:$0xff]  ;;  %v290_v33 = vld [vmem:[%s3286_s0 + $0x280] sm:$0xff]  ;;  %v354_v35 = vmax.f32 %v242_v20, 0.0  ;;  %v361_v36 = vmax.f32 %v249_v21, 0.0  ;;  %v387_v43 = vmax.f32 %v275_v31, 0.0 }
  0x4a   : > { %1964 = vmatprep.subr.bf16.mxu0 %v1963_v61  ;;  %2076 = vmatprep.subr.bf16.mxu1 %v1963_v61  ;;  %v255_v61 = vld [vmem:[%s3286_s0 + $0x168] sm:$0xff]  ;;  %v352_v8 = vmax.f32 %v240_v58, 0.0  ;;  %v257_v37 = vld [vmem:[%s3286_s0 + $0x178] sm:$0xff]  ;;  %v1989_v41 = vpack.c.bf16 %v373_v26, %v366_v25  ;;  %v1991_v44 = vpack.c.bf16 %v388_v29, %v381_v28  ;;  %v395_v45 = vmax.f32 %v283_v32, 0.0  ;;  %v282_v47 = vld [vmem:[%s3286_s0 + $0x240] sm:$0xff] }
  0x4b   : > { %v367_v11 = vmax.f32 %v255_v61, 0.0  ;;  %v2589_v40 = vld [vmem:[%s2344_s28 + $0xd8] sm:$0xff]  ;;  %v402_v46 = vmax.f32 %v290_v33, 0.0  ;;  %v369_v54 = vmax.f32 %v257_v37, 0.0  ;;  %v2614_v58 = vld [vmem:[%s2344_s28 + $0x20] sm:$0xff]  ;;  %v394_v61 = vmax.f32 %v282_v47, 0.0 }
  0x4c   : > { %v1985_v24 = vpack.c.bf16 %v359_v9, %v352_v8  ;;  %v289_v48 = vld [vmem:[%s3286_s0 + $0x278] sm:$0xff]  ;;  %v2617_v59 = vld [vmem:[%s2344_s28 + $0xe0] sm:$0xff]  ;;  %v296_v3 = vld [vmem:[%s3286_s0 + $0x2b0] sm:$0xff] }
  0x4d   : > { %1966 = vmatpush1.bf16.msra.mxu0 %v1965_v5  ;;  %2084 = vmatpush1.bf16.msra.mxu1 %v1965_v5  ;;  %v2529_v5 = vld [vmem:[%s2344_s28 + $0x8] sm:$0xff]  ;;  %v1987_v27 = vpack.c.bf16 %v374_v12, %v367_v11  ;;  %v297_v49 = vld [vmem:[%s3286_s0 + $0x2b8] sm:$0xff]  ;;  %v401_v62 = vmax.f32 %v289_v48, 0.0  ;;  %v318_v8 = vld [vmem:[%s3286_s0 + $0x360] sm:$0xff]  ;;  %v408_v17 = vmax.f32 %v296_v3, 0.0 }
  0x4e   : > { %1968 = vmatprep.subr.bf16.mxu0 %v1967_v10  ;;  %2077 = vmatprep.subr.bf16.mxu1 %v1967_v10  ;;  %v1983_v10 = vpack.c.bf16 %v360_v57, %v353_v56  ;;  %v256_v56 = vld [vmem:[%s3286_s0 + $0x170] sm:$0xff]  ;;  %v263_v57 = vld [vmem:[%s3286_s0 + $0x1a8] sm:$0xff]  ;;  %v409_v1 = vmax.f32 %v297_v49, 0.0  ;;  %v278_v13 = vld [vmem:[%s3286_s0 + $0x220] sm:$0xff]  ;;  %v430_v21 = vmax.f32 %v318_v8, 0.0 }
  0x4f   : > { %v375_v11 = vmax.f32 %v263_v57, 0.0  ;;  %v271_v12 = vld [vmem:[%s3286_s0 + $0x1e8] sm:$0xff]  ;;  %v1997_v16 = vpack.c.bf16 %v401_v62, %v394_v61  ;;  %v317_v25 = vld [vmem:[%s3286_s0 + $0x358] sm:$0xff]  ;;  %v216_v26 = vld [vmem:[%s3286_s0 + $0x30] sm:$0xff] }
  0x50   : > { %v2642_v14 = vld [vmem:[%s2344_s28 + $0x28] sm:$0xff]  ;;  %v383_v29 = vmax.f32 %v271_v12, 0.0  ;;  %v270_v31 = vld [vmem:[%s3286_s0 + $0x1e0] sm:$0xff]  ;;  %v277_v32 = vld [vmem:[%s3286_s0 + $0x218] sm:$0xff]  ;;  %v429_v37 = vmax.f32 %v317_v25, 0.0 }
  0x51   : > { %1970 = vmatpush1.bf16.msra.mxu0 %v1969_v19  ;;  %2085 = vmatpush1.bf16.msra.mxu1 %v1969_v19  ;;  %v362_v19 = vmax.f32 %v250_v4, 0.0  ;;  %v303_v4 = vld [vmem:[%s3286_s0 + $0x2e8] sm:$0xff]  ;;  %v2670_v33 = vld [vmem:[%s2344_s28 + $0x30] sm:$0xff]  ;;  %v389_v47 = vmax.f32 %v277_v32, 0.0  ;;  %v285_v48 = vld [vmem:[%s3286_s0 + $0x258] sm:$0xff] }
  0x52   : > { %1972 = vmatprep.subr.bf16.mxu0 %v1971_v22  ;;  %2078 = vmatprep.subr.bf16.mxu1 %v1971_v22  ;;  %v2558_v22 = vld [vmem:[%s2344_s28 + $0x10] sm:$0xff]  ;;  %v291_v61 = vld [vmem:[%s3286_s0 + $0x288] sm:$0xff]  ;;  %v2720_v8 = vld [vmem:[%s2344_s28 + $0x40] sm:$0xff] }
  0x53   : > { %v2015_v34 = vpack.c.bf16 %v362_v19, %v355_v18  ;;  %v415_v18 = vmax.f32 %v303_v4, 0.0  ;;  %v292_v49 = vld [vmem:[%s3286_s0 + $0x290] sm:$0xff]  ;;  %v251_v3 = vld [vmem:[%s3286_s0 + $0x148] sm:$0xff]  ;;  %v313_v25 = vld [vmem:[%s3286_s0 + $0x338] sm:$0xff] }
  0x54   : > { %v299_v4 = vld [vmem:[%s3286_s0 + $0x2c8] sm:$0xff] }
  0x55   : > { %1974 = vmatpush1.bf16.msra.mxu0 %v1973_v30  ;;  %2086 = vmatpush1.bf16.msra.mxu1 %v1973_v30  ;;  %v268_v30 = vld [vmem:[%s3286_s0 + $0x1d0] sm:$0xff] }
  0x56   : > { %1976 = vmatprep.subr.bf16.mxu1 %v1975_v38  ;;  %2008 = vmatprep.subr.bf16.mxu0 %v2007_v39  ;;  %v264_v38 = vld [vmem:[%s3286_s0 + $0x1b0] sm:$0xff]  ;;  %v2586_v39 = vld [vmem:[%s2344_s28 + $0x18] sm:$0xff]  ;;  %v380_v42 = vmax.f32 %v268_v30, 0.0  ;;  %v390_v30 = vmax.f32 %v278_v13, 0.0  ;;  %v363_v13 = vmax.f32 %v251_v3, 0.0 }
  0x57   : > { %v376_v55 = vmax.f32 %v264_v38, 0.0  ;;  %v300_v3 = vld [vmem:[%s3286_s0 + $0x2d0] sm:$0xff] }
  0x58   : > { %531 = vmatmul.mubr.f32.vlgmr.msra.gmra.mrb[0].mxu0 %v2503_v50  ;;  %675 = vmatmul.mubr.f32.vlgmr.msra.gmra.mrb[0].mxu1 %v2506_v51 }
  0x59   : > { %1978 = vmatpush1.bf16.msra.mxu1 %v1977_v52  ;;  %2010 = vmatpush1.bf16.msra.mxu0 %v2009_v53  ;;  %v304_v52 = vld [vmem:[%s3286_s0 + $0x2f0] sm:$0xff]  ;;  %v2017_v53 = vpack.c.bf16 %v361_v36, %v354_v35  ;;  %v2019_v9 = vpack.c.bf16 %v376_v55, %v369_v54  ;;  %v2001_v35 = vpack.c.bf16 %v415_v18, %v408_v17  ;;  %v411_v17 = vmax.f32 %v299_v4, 0.0  ;;  %v307_v4 = vld [vmem:[%s3286_s0 + $0x308] sm:$0xff] }
  0x5a   : > { %536 = vmatprep.mubr.f32.mxu0 %v2231_v0  ;;  %680 = vmatprep.mubr.f32.mxu1 %v2231_v0  ;;  %v416_v2 = vmax.f32 %v304_v52, 0.0  ;;  %v2692_v52 = vld [vmem:[%s2344_s28 + $0x38] sm:$0xff] }
  0x5b   : > { %1980 = vmatprep.subr.bf16.mxu1 %v1979_v60  ;;  %2012 = vmatprep.subr.bf16.mxu0 %v2011_v63  ;;  %v1993_v60 = vpack.c.bf16 %v387_v43, %v380_v42  ;;  %v1995_v63 = vpack.c.bf16 %v402_v46, %v395_v45  ;;  %v2023_v43 = vpack.c.bf16 %v390_v30, %v383_v29  ;;  %v237_v45 = vld [vmem:[%s3286_s0 + $0xd8] sm:$0xff]  ;;  %v382_v46 = vmax.f32 %v270_v31, 0.0 }
  0x5c   : > { %537 = vmatmul.mubr.f32.gmra.mrb[2].mxu0 %v2529_v5  ;;  %681 = vmatmul.mubr.f32.gmra.mrb[2].mxu1 %v2532_v6  ;;  %v1999_v19 = vpack.c.bf16 %v416_v2, %v409_v1  ;;  %v349_v57 = vmax.f32 %v237_v45, 0.0  ;;  %v404_v1 = vmax.f32 %v292_v49, 0.0  ;;  %v244_v2 = vld [vmem:[%s3286_s0 + $0x110] sm:$0xff] }
  0x5d   : > { %1982 = vmatpush1.bf16.msra.mxu1 %v1981_v7  ;;  %542 = vmatprep.mubr.f32.mxu0 %v2231_v0  ;;  %v311_v7 = vld [vmem:[%s3286_s0 + $0x328] sm:$0xff]  ;;  %v2025_v62 = vpack.c.bf16 %v389_v47, %v382_v46  ;;  %v356_v12 = vmax.f32 %v244_v2, 0.0  ;;  %v2765_v45 = vld [vmem:[%s2344_s28 + $0x50] sm:$0xff] }
  0x5e   : > { %686 = vmatprep.mubr.f32.mxu1 %v2231_v0  ;;  %1984 = vmatprep.subr.bf16.mxu1 %v1983_v10  ;;  %v368_v10 = vmax.f32 %v256_v56, 0.0  ;;  %v423_v20 = vmax.f32 %v311_v7, 0.0  ;;  %v306_v7 = vld [vmem:[%s3286_s0 + $0x300] sm:$0xff] }
  0x5f   : > { %2014 = vmatpush1.bf16.msra.mxu0 %v2013_v15  ;;  %v2645_v15 = vld [vmem:[%s2344_s28 + $0xe8] sm:$0xff]  ;;  %v418_v18 = vmax.f32 %v306_v7, 0.0  ;;  %v2047_v29 = vpack.c.bf16 %v363_v13, %v356_v12  ;;  %v2791_v7 = vld [vmem:[%s2344_s28 + $0x60] sm:$0xff]  ;;  %v321_v13 = vld [vmem:[%s3286_s0 + $0x378] sm:$0xff] }
  0x60   : > { %543 = vmatmul.mubr.f32.gmra.mrb[4].mxu0 %v2558_v22  ;;  %687 = vmatmul.mubr.f32.gmra.mrb[4].mxu1 %v2561_v23  ;;  %v2021_v28 = vpack.c.bf16 %v375_v11, %v368_v10  ;;  %v2003_v38 = vpack.c.bf16 %v430_v21, %v423_v20  ;;  %v403_v10 = vmax.f32 %v291_v61, 0.0  ;;  %v305_v20 = vld [vmem:[%s3286_s0 + $0x2f8] sm:$0xff]  ;;  %v258_v21 = vld [vmem:[%s3286_s0 + $0x180] sm:$0xff] }
  0x61   : > { %1986 = vmatpush1.bf16.msra.mxu1 %v1985_v24  ;;  %548 = vmatprep.mubr.f32.mxu0 %v2231_v0  ;;  %v310_v24 = vld [vmem:[%s3286_s0 + $0x320] sm:$0xff]  ;;  %v417_v31 = vmax.f32 %v305_v20, 0.0  ;;  %v370_v32 = vmax.f32 %v258_v21, 0.0  ;;  %v2778_v61 = vld [vmem:[%s2344_s28 + $0x58] sm:$0xff]  ;;  %v2811_v20 = vld [vmem:[%s2344_s28 + $0x70] sm:$0xff] }
  0x62   : > { %692 = vmatprep.mubr.f32.mxu1 %v2231_v0  ;;  %1988 = vmatprep.subr.bf16.mxu1 %v1987_v27  ;;  %v223_v27 = vld [vmem:[%s3286_s0 + $0x68] sm:$0xff]  ;;  %v422_v36 = vmax.f32 %v310_v24, 0.0  ;;  %v265_v24 = vld [vmem:[%s3286_s0 + $0x1b8] sm:$0xff]  ;;  %v314_v12 = vld [vmem:[%s3286_s0 + $0x340] sm:$0xff] }
  0x63   : > { %2016 = vmatprep.subr.bf16.mxu0 %v2015_v34  ;;  %v2673_v34 = vld [vmem:[%s2344_s28 + $0xf0] sm:$0xff]  ;;  %v335_v42 = vmax.f32 %v223_v27, 0.0  ;;  %v2745_v27 = vld [vmem:[%s2344_s28 + $0x48] sm:$0xff] }
  0x64   : > { %549 = vmatmul.mubr.f32.gmra.mrb[6].mxu0 %v2586_v39  ;;  %693 = vmatmul.mubr.f32.gmra.mrb[6].mxu1 %v2589_v40  ;;  %v2005_v54 = vpack.c.bf16 %v429_v37, %v422_v36  ;;  %v377_v36 = vmax.f32 %v265_v24, 0.0  ;;  %v425_v37 = vmax.f32 %v313_v25, 0.0  ;;  %v2818_v24 = vld [vmem:[%s2344_s28 + $0x78] sm:$0xff]  ;;  %v2825_v25 = vld [vmem:[%s2344_s28 + $0x80] sm:$0xff] }
  0x65   : > { %1990 = vmatpush1.bf16.msra.mxu1 %v1989_v41  ;;  %554 = vmatprep.mubr.f32.mxu0 %v2231_v0  ;;  %v328_v41 = vmax.f32 %v216_v26, 0.0  ;;  %v320_v26 = vld [vmem:[%s3286_s0 + $0x370] sm:$0xff] }
  0x66   : > { %698 = vmatprep.mubr.f32.mxu1 %v2231_v0  ;;  %1992 = vmatprep.subr.bf16.mxu1 %v1991_v44  ;;  %v230_v44 = vld [vmem:[%s3286_s0 + $0xa0] sm:$0xff]  ;;  %v2051_v49 = vpack.c.bf16 %v377_v36, %v370_v32  ;;  %v2867_v32 = vld [vmem:[%s2344_s28 + $0xb0] sm:$0xff] }
  0x67   : > { %2018 = vmatpush1.bf16.msra.mxu0 %v2017_v53  ;;  %v2695_v53 = vld [vmem:[%s2344_s28 + $0xf8] sm:$0xff]  ;;  %v2039_v55 = vpack.c.bf16 %v335_v42, %v328_v41  ;;  %v342_v56 = vmax.f32 %v230_v44, 0.0  ;;  %v312_v41 = vld [vmem:[%s3286_s0 + $0x330] sm:$0xff]  ;;  %v319_v42 = vld [vmem:[%s3286_s0 + $0x368] sm:$0xff] }
  0x68   : > { %555 = vmatmul.mubr.f32.gmra.mrb[8].mxu0 %v2614_v58  ;;  %699 = vmatmul.mubr.f32.gmra.mrb[8].mxu1 %v2617_v59  ;;  %v279_v44 = vld [vmem:[%s3286_s0 + $0x228] sm:$0xff]  ;;  %v424_v47 = vmax.f32 %v312_v41, 0.0 }
  0x69   : > { %1994 = vmatpush1.bf16.msra.mxu1 %v1993_v60  ;;  %560 = vmatprep.mubr.f32.mxu0 %v2231_v0  ;;  %v284_v60 = vld [vmem:[%s3286_s0 + $0x250] sm:$0xff]  ;;  %v2043_v11 = vpack.c.bf16 %v349_v57, %v342_v56  ;;  %v391_v56 = vmax.f32 %v279_v44, 0.0  ;;  %v286_v57 = vld [vmem:[%s3286_s0 + $0x260] sm:$0xff] }
  0x6a   : > { %704 = vmatprep.mubr.f32.mxu1 %v2231_v0  ;;  %1996 = vmatprep.subr.bf16.mxu1 %v1995_v63  ;;  %v397_v63 = vmax.f32 %v285_v48, 0.0  ;;  %v431_v48 = vmax.f32 %v319_v42, 0.0 }
  0x6b   : > { %2020 = vmatprep.subr.bf16.mxu0 %v2019_v9  ;;  %v396_v9 = vmax.f32 %v284_v60, 0.0  ;;  %v293_v60 = vld [vmem:[%s3286_s0 + $0x298] sm:$0xff] }
  0x6c   : > { %561 = vmatmul.mubr.f32.gmra.mrb[10].mxu0 %v2642_v14  ;;  %705 = vmatmul.mubr.f32.gmra.mrb[10].mxu1 %v2645_v15  ;;  %v405_v2 = vmax.f32 %v293_v60, 0.0 }
  0x6d   : > { %1998 = vmatpush1.bf16.msra.mxu1 %v1997_v16  ;;  %566 = vmatprep.mubr.f32.mxu0 %v2231_v0  ;;  %v2027_v16 = vpack.c.bf16 %v404_v1, %v397_v63  ;;  %v398_v1 = vmax.f32 %v286_v57, 0.0 }
  0x6e   : > { %710 = vmatprep.mubr.f32.mxu1 %v2231_v0  ;;  %2000 = vmatprep.subr.bf16.mxu1 %v1999_v19  ;;  %v298_v19 = vld [vmem:[%s3286_s0 + $0x2c0] sm:$0xff] }
  0x6f   : > { %2022 = vmatpush1.bf16.msra.mxu0 %v2021_v28  ;;  %v2029_v28 = vpack.c.bf16 %v403_v10, %v396_v9  ;;  %v410_v30 = vmax.f32 %v298_v19, 0.0  ;;  %v2059_v9 = vpack.c.bf16 %v405_v2, %v398_v1  ;;  %v412_v10 = vmax.f32 %v300_v3, 0.0 }
  0x70   : > { %567 = vmatmul.mubr.f32.gmra.mrb[12].mxu0 %v2670_v33  ;;  %711 = vmatmul.mubr.f32.gmra.mrb[12].mxu1 %v2673_v34  ;;  %v433_v19 = vmax.f32 %v321_v13, 0.0 }
  0x71   : > { %2002 = vmatpush1.bf16.msra.mxu1 %v2001_v35  ;;  %572 = vmatprep.mubr.f32.mxu0 %v2231_v0  ;;  %v2031_v35 = vpack.c.bf16 %v418_v18, %v411_v17  ;;  %v2033_v46 = vpack.c.bf16 %v417_v31, %v410_v30  ;;  %v426_v18 = vmax.f32 %v314_v12, 0.0  ;;  %v2853_v30 = vld [vmem:[%s2344_s28 + $0xa0] sm:$0xff]  ;;  %v2860_v31 = vld [vmem:[%s2344_s28 + $0xa8] sm:$0xff] }
  0x72   : > { %716 = vmatprep.mubr.f32.mxu1 %v2231_v0  ;;  %2004 = vmatprep.subr.bf16.mxu1 %v2003_v38  ;;  %v432_v38 = vmax.f32 %v320_v26, 0.0  ;;  %v2832_v26 = vld [vmem:[%s2344_s28 + $0x88] sm:$0xff] }
  0x73   : > { %2024 = vmatprep.subr.bf16.mxu0 %v2023_v43  ;;  %v272_v43 = vld [vmem:[%s3286_s0 + $0x1f0] sm:$0xff]  ;;  %v2067_v21 = vpack.c.bf16 %v433_v19, %v426_v18 }
  0x74   : > { %573 = vmatmul.mubr.f32.gmra.mrb[14].mxu0 %v2692_v52  ;;  %717 = vmatmul.mubr.f32.gmra.mrb[14].mxu1 %v2695_v53 }
  0x75   : > { %2006 = vmatpush1.bf16.msra.mxu1 %v2005_v54  ;;  %578 = vmatprep.mubr.f32.mxu0 %v2231_v0  ;;  %v2035_v54 = vpack.c.bf16 %v432_v38, %v425_v37 }
  0x76   : > { %787 = vmatprep.mubr.f32.mxu1 %v2231_v0  ;;  %2040 = vmatprep.subr.bf16.mxu1 %v2039_v55 }
  0x77   : > { %2026 = vmatpush1.bf16.msra.mxu0 %v2025_v62  ;;  %v2037_v62 = vpack.c.bf16 %v431_v48, %v424_v47 }
  0x78   : > { %579 = vmatmul.mubr.f32.gmra.mrb[16].mxu0 %v2720_v8  ;;  %788 = vmatmul.mubr.f32.vlgmr.msra.gmra.mrb[16].mxu1 %v2503_v50 }
  0x79   : > { %2042 = vmatpush3.bf16.msra.mxu1 %v2039_v55  ;;  %584 = vmatprep.mubr.f32.mxu0 %v2231_v0  ;;  %v384_v55 = vmax.f32 %v272_v43, 0.0 }
  0x7a   : > { %793 = vmatprep.mubr.f32.mxu1 %v2231_v0  ;;  %2044 = vmatprep.subr.bf16.mxu1 %v2043_v11 }
  0x7b   : > { %2028 = vmatprep.subr.bf16.mxu0 %v2027_v16  ;;  %v2055_v63 = vpack.c.bf16 %v391_v56, %v384_v55  ;;  %v2804_v16 = vld [vmem:[%s2344_s28 + $0x68] sm:$0xff] }
  0x7c   : > { %585 = vmatmul.mubr.f32.gmra.mrb[18].mxu0 %v2745_v27  ;;  %794 = vmatmul.mubr.f32.gmra.mrb[18].mxu1 %v2529_v5 }
  0x7d   : > { %590 = vmatprep.mubr.f32.mxu0 %v2231_v0  ;;  %799 = vmatprep.mubr.f32.mxu1 %v2231_v0 }
  0x7e   : > { %2046 = vmatpush3.bf16.msra.mxu1 %v2043_v11  ;;  %2030 = vmatpush1.bf16.msra.mxu0 %v2029_v28  ;;  %v419_v11 = vmax.f32 %v307_v4, 0.0  ;;  %v2839_v28 = vld [vmem:[%s2344_s28 + $0x90] sm:$0xff] }
  0x7f   : > { %2048 = vmatprep.subr.bf16.mxu1 %v2047_v29  ;;  %2032 = vmatprep.subr.bf16.mxu0 %v2031_v35  ;;  %v2874_v35 = vld [vmem:[%s2344_s28 + $0xb8] sm:$0xff] }
  0x80   : > { %591 = vmatmul.mubr.f32.gmra.mrb[20].mxu0 %v2765_v45  ;;  %800 = vmatmul.mubr.f32.gmra.mrb[20].mxu1 %v2558_v22  ;;  %v2063_v17 = vpack.c.bf16 %v419_v11, %v412_v10 }
  0x81   : > { %596 = vmatprep.mubr.f32.mxu0 %v2231_v0  ;;  %805 = vmatprep.mubr.f32.mxu1 %v2231_v0 }
  0x82   : > { %2050 = vmatpush3.bf16.msra.mxu1 %v2047_v29  ;;  %2034 = vmatpush1.bf16.msra.mxu0 %v2033_v46  ;;  %v2846_v29 = vld [vmem:[%s2344_s28 + $0x98] sm:$0xff]  ;;  %s1810_s28 = sshll.u32 %s2218_s12, 5 }
  0x83   : > { %2052 = vmatprep.subr.bf16.mxu1 %v2051_v49  ;;  %2036 = vmatprep.subr.bf16.mxu0 %v2035_v54  ;;  %p202_p7 = scmp.lt.s32.totalorder %s1810_s28, 63 }
  0x84   : > { %597 = vmatmul.mubr.f32.gmra.mrb[22].mxu0 %v2778_v61  ;;  %806 = vmatmul.mubr.f32.gmra.mrb[22].mxu1 %v2586_v39 }
  0x85   : > { %602 = vmatprep.mubr.f32.mxu0 %v2231_v0  ;;  %811 = vmatprep.mubr.f32.mxu1 %v2231_v0  ;;  %s3300_s28 = smov (!%p202_p7, %s1810_s28), 63 }
  0x86   : > { %2054 = vmatpush3.bf16.msra.mxu1 %v2051_v49  ;;  %2038 = vmatpush1.bf16.msra.mxu0 %v2037_v62  ;;  %s2087_s12 = smul.u32 56, %s3300_s28 }
  0x87   : > { %2056 = vmatprep.subr.bf16.mxu1 %v2055_v63 }
  0x88   : > { %603 = vmatmul.mubr.f32.gmra.mrb[24].mxu0 %v2791_v7  ;;  %812 = vmatmul.mubr.f32.gmra.mrb[24].mxu1 %v2614_v58  ;;  %s2998_s20 = scalar_lea.vmem %s3288_s2, %s2087_s12 }
  0x89   : > { %608 = vmatprep.mubr.f32.mxu0 %v2231_v0  ;;  %817 = vmatprep.mubr.f32.mxu1 %v2231_v0 }
  0x8a   : > { %2058 = vmatpush3.bf16.msra.mxu1 %v2055_v63 }
  0x8b   : > { %2060 = vmatprep.subr.bf16.mxu1 %v2059_v9 }
  0x8c   : > { %609 = vmatmul.mubr.f32.gmra.mrb[26].mxu0 %v2804_v16  ;;  %818 = vmatmul.mubr.f32.gmra.mrb[26].mxu1 %v2642_v14 }
  0x8d   : > { %614 = vmatprep.mubr.f32.mxu0 %v2231_v0  ;;  %823 = vmatprep.mubr.f32.mxu1 %v2231_v0 }
  0x8e   : > { %2062 = vmatpush3.bf16.msra.mxu1 %v2059_v9 }
  0x8f   : > { %2064 = vmatprep.subr.bf16.mxu1 %v2063_v17 }
  0x90   : > { %615 = vmatmul.mubr.f32.gmra.mrb[28].mxu0 %v2811_v20  ;;  %824 = vmatmul.mubr.f32.gmra.mrb[28].mxu1 %v2670_v33 }
  0x91   : > { %620 = vmatprep.mubr.f32.mxu0 %v2231_v0  ;;  %829 = vmatprep.mubr.f32.mxu1 %v2231_v0 }
  0x92   : > { %2066 = vmatpush3.bf16.msra.mxu1 %v2063_v17 }
  0x93   : > { %2068 = vmatprep.subr.bf16.mxu1 %v2067_v21 }
  0x94   : > { %621 = vmatmul.mubr.f32.gmra.mrb[30].mxu0 %v2818_v24  ;;  %830 = vmatmul.mubr.f32.gmra.mrb[30].mxu1 %v2692_v52 }
  0x95   : > { %626 = vmatprep.mubr.f32.mxu0 %v2231_v0  ;;  %835 = vmatprep.mubr.f32.mxu1 %v2231_v0 }
  0x96   : > { %2070 = vmatpush3.bf16.msra.mxu1 %v2067_v21 }
  0x98   : > { %627 = vmatmul.mubr.f32.gmra.mrb[32].mxu0 %v2825_v25  ;;  %836 = vmatmul.mubr.f32.gmra.mrb[32].mxu1 %v2720_v8 }
  0x99   : > { %632 = vmatprep.mubr.f32.mxu0 %v2231_v0  ;;  %841 = vmatprep.mubr.f32.mxu1 %v2231_v0 }
  0x9c   : > { %633 = vmatmul.mubr.f32.gmra.mrb[34].mxu0 %v2832_v26  ;;  %842 = vmatmul.mubr.f32.gmra.mrb[34].mxu1 %v2745_v27 }
  0x9d   : > { %638 = vmatprep.mubr.f32.mxu0 %v2231_v0  ;;  %847 = vmatprep.mubr.f32.mxu1 %v2231_v0 }
  0xa0   : > { %639 = vmatmul.mubr.f32.gmra.mrb[36].mxu0 %v2839_v28  ;;  %848 = vmatmul.mubr.f32.gmra.mrb[36].mxu1 %v2765_v45 }
  0xa1   : > { %644 = vmatprep.mubr.f32.mxu0 %v2231_v0  ;;  %853 = vmatprep.mubr.f32.mxu1 %v2231_v0 }
  0xa4   : > { %645 = vmatmul.mubr.f32.gmra.mrb[38].mxu0 %v2846_v29  ;;  %854 = vmatmul.mubr.f32.gmra.mrb[38].mxu1 %v2778_v61 }
  0xa5   : > { %650 = vmatprep.mubr.f32.mxu0 %v2231_v0  ;;  %859 = vmatprep.mubr.f32.mxu1 %v2231_v0 }
  0xa8   : > { %651 = vmatmul.mubr.f32.gmra.mrb[40].mxu0 %v2853_v30  ;;  %860 = vmatmul.mubr.f32.gmra.mrb[40].mxu1 %v2791_v7 }
  0xa9   : > { %656 = vmatprep.mubr.f32.mxu0 %v2231_v0  ;;  %865 = vmatprep.mubr.f32.mxu1 %v2231_v0 }
  0xac   : > { %657 = vmatmul.mubr.f32.gmra.mrb[42].mxu0 %v2860_v31  ;;  %866 = vmatmul.mubr.f32.gmra.mrb[42].mxu1 %v2804_v16 }
  0xad   : > { %662 = vmatprep.mubr.f32.mxu0 %v2231_v0  ;;  %871 = vmatprep.mubr.f32.mxu1 %v2231_v0 }
  0xb0   : > { %663 = vmatmul.mubr.f32.gmra.mrb[44].mxu0 %v2867_v32  ;;  %872 = vmatmul.mubr.f32.gmra.mrb[44].mxu1 %v2811_v20 }
  0xb1   : > { %668 = vmatprep.mubr.f32.mxu0 %v2231_v0  ;;  %877 = vmatprep.mubr.f32.mxu1 %v2231_v0 }
  0xb4   : > { %669 = vmatmul.mubr.f32.gmra.mrb[46].mxu0 %v2874_v35  ;;  %878 = vmatmul.mubr.f32.gmra.mrb[46].mxu1 %v2818_v24 }
  0xb5   : > { %883 = vmatprep.mubr.f32.mxu1 %v2231_v0  ;;  %1044 = vmatprep.mubr.f32.mxu0 %v2231_v0 }
  0xb8   : > { %884 = vmatmul.mubr.f32.gmra.mrb[48].mxu1 %v2825_v25  ;;  %1045 = vmatmul.mubr.f32.vlgmr.msra.gmra.mrb[48].mxu0 %v2503_v50 }
  0xb9   : > { %889 = vmatprep.mubr.f32.mxu1 %v2231_v0  ;;  %1050 = vmatprep.mubr.f32.mxu0 %v2231_v0 }
  0xbc   : > { %890 = vmatmul.mubr.f32.gmra.mrb[50].mxu1 %v2832_v26  ;;  %1051 = vmatmul.mubr.f32.gmra.mrb[50].mxu0 %v2529_v5 }
  0xbd   : > { %895 = vmatprep.mubr.f32.mxu1 %v2231_v0  ;;  %1056 = vmatprep.mubr.f32.mxu0 %v2231_v0 }
  0xc0   : > { %896 = vmatmul.mubr.f32.gmra.mrb[52].mxu1 %v2839_v28  ;;  %1057 = vmatmul.mubr.f32.gmra.mrb[52].mxu0 %v2558_v22 }
  0xc1   : > { %901 = vmatprep.mubr.f32.mxu1 %v2231_v0  ;;  %1062 = vmatprep.mubr.f32.mxu0 %v2231_v0 }
  0xc4   : > { %902 = vmatmul.mubr.f32.gmra.mrb[54].mxu1 %v2846_v29  ;;  %1063 = vmatmul.mubr.f32.gmra.mrb[54].mxu0 %v2586_v39 }
  0xc5   : > { %907 = vmatprep.mubr.f32.mxu1 %v2231_v0  ;;  %1068 = vmatprep.mubr.f32.mxu0 %v2231_v0 }
  0xc8   : > { %908 = vmatmul.mubr.f32.gmra.mrb[56].mxu1 %v2853_v30  ;;  %1069 = vmatmul.mubr.f32.gmra.mrb[56].mxu0 %v2614_v58 }
  0xc9   : > { %913 = vmatprep.mubr.f32.mxu1 %v2231_v0  ;;  %1074 = vmatprep.mubr.f32.mxu0 %v2231_v0 }
  0xcc   : > { %914 = vmatmul.mubr.f32.gmra.mrb[58].mxu1 %v2860_v31  ;;  %1075 = vmatmul.mubr.f32.gmra.mrb[58].mxu0 %v2642_v14 }
  0xcd   : > { %919 = vmatprep.mubr.f32.mxu1 %v2231_v0  ;;  %1080 = vmatprep.mubr.f32.mxu0 %v2231_v0 }
  0xd0   : > { %920 = vmatmul.mubr.f32.gmra.mrb[60].mxu1 %v2867_v32  ;;  %1081 = vmatmul.mubr.f32.gmra.mrb[60].mxu0 %v2670_v33 }
  0xd1   : > { %925 = vmatprep.mubr.f32.mxu1 %v2231_v0  ;;  %1086 = vmatprep.mubr.f32.mxu0 %v2231_v0 }
  0xd4   : > { %926 = vmatmul.mubr.f32.gmra.mrb[62].mxu1 %v2874_v35  ;;  %1087 = vmatmul.mubr.f32.gmra.mrb[62].mxu0 %v2692_v52 }
  0xd5   : > { %931 = vmatprep.mubr.f32.mxu1 %v2231_v0  ;;  %1092 = vmatprep.mubr.f32.mxu0 %v2231_v0 }
  0xd8   : > { %932 = vmatmul.mubr.f32.gmra.mrb[64].mxu1 %v2506_v51  ;;  %1093 = vmatmul.mubr.f32.gmra.mrb[64].mxu0 %v2720_v8 }
  0xd9   : > { %937 = vmatprep.mubr.f32.mxu1 %v2231_v0  ;;  %1098 = vmatprep.mubr.f32.mxu0 %v2231_v0 }
  0xdc   : > { %938 = vmatmul.mubr.f32.gmra.mrb[66].mxu1 %v2532_v6  ;;  %1099 = vmatmul.mubr.f32.gmra.mrb[66].mxu0 %v2745_v27 }
  0xdd   : > { %943 = vmatprep.mubr.f32.mxu1 %v2231_v0  ;;  %1104 = vmatprep.mubr.f32.mxu0 %v2231_v0 }
  0xe0   : > { %944 = vmatmul.mubr.f32.gmra.mrb[68].mxu1 %v2561_v23  ;;  %1105 = vmatmul.mubr.f32.gmra.mrb[68].mxu0 %v2765_v45 }
  0xe1   : > { %949 = vmatprep.mubr.f32.mxu1 %v2231_v0  ;;  %1110 = vmatprep.mubr.f32.mxu0 %v2231_v0 }
  0xe4   : > { %950 = vmatmul.mubr.f32.gmra.mrb[70].mxu1 %v2589_v40  ;;  %1111 = vmatmul.mubr.f32.gmra.mrb[70].mxu0 %v2778_v61 }
  0xe5   : > { %955 = vmatprep.mubr.f32.mxu1 %v2231_v0  ;;  %1116 = vmatprep.mubr.f32.mxu0 %v2231_v0 }
  0xe8   : > { %956 = vmatmul.mubr.f32.gmra.mrb[72].mxu1 %v2617_v59  ;;  %1117 = vmatmul.mubr.f32.gmra.mrb[72].mxu0 %v2791_v7 }
  0xe9   : > { %961 = vmatprep.mubr.f32.mxu1 %v2231_v0  ;;  %1122 = vmatprep.mubr.f32.mxu0 %v2231_v0 }
  0xec   : > { %962 = vmatmul.mubr.f32.gmra.mrb[74].mxu1 %v2645_v15  ;;  %1123 = vmatmul.mubr.f32.gmra.mrb[74].mxu0 %v2804_v16 }
  0xed   : > { %967 = vmatprep.mubr.f32.mxu1 %v2231_v0  ;;  %1128 = vmatprep.mubr.f32.mxu0 %v2231_v0 }
  0xf0   : > { %968 = vmatmul.mubr.f32.gmra.mrb[76].mxu1 %v2673_v34  ;;  %1129 = vmatmul.mubr.f32.gmra.mrb[76].mxu0 %v2811_v20 }
  0xf1   : > { %973 = vmatprep.mubr.f32.mxu1 %v2231_v0  ;;  %1134 = vmatprep.mubr.f32.mxu0 %v2231_v0 }
  0xf4   : > { %974 = vmatmul.mubr.f32.gmra.mrb[78].mxu1 %v2695_v53  ;;  %1135 = vmatmul.mubr.f32.gmra.mrb[78].mxu0 %v2818_v24 }
  0xf5   : > { %1140 = vmatprep.mubr.f32.mxu0 %v2231_v0  ;;  %1895 = vmatprep.mubr.f32.mxu1 %v2503_v50 }
  0xf8   : > { %1141 = vmatmul.mubr.f32.gmra.mrb[80].mxu0 %v2825_v25  ;;  %1896 = vmatmul.mubr.f32.vlgmr.msra.gmra.mrb[80].mxu1 %v2529_v5 }
  0xf9   : > { %1146 = vmatprep.mubr.f32.mxu0 %v2231_v0  ;;  %1898 = vmatprep.mubr.f32.mxu1 %v2558_v22 }
  0xfc   : > { %1147 = vmatmul.mubr.f32.gmra.mrb[82].mxu0 %v2832_v26  ;;  %1899 = vmatmul.mubr.f32.gmra.mrb[82].mxu1 %v2586_v39 }
  0xfd   : > { %1152 = vmatprep.mubr.f32.mxu0 %v2231_v0  ;;  %1901 = vmatprep.mubr.f32.mxu1 %v2614_v58 }
 0x100   : > { %1153 = vmatmul.mubr.f32.gmra.mrb[84].mxu0 %v2839_v28  ;;  %1902 = vmatmul.mubr.f32.gmra.mrb[84].mxu1 %v2642_v14 }
 0x101   : > { %1158 = vmatprep.mubr.f32.mxu0 %v2231_v0  ;;  %1904 = vmatprep.mubr.f32.mxu1 %v2670_v33 }
 0x104   : > { %1159 = vmatmul.mubr.f32.gmra.mrb[86].mxu0 %v2846_v29  ;;  %1905 = vmatmul.mubr.f32.gmra.mrb[86].mxu1 %v2692_v52 }
 0x105   : > { %1164 = vmatprep.mubr.f32.mxu0 %v2231_v0  ;;  %1907 = vmatprep.mubr.f32.mxu1 %v2720_v8 }
 0x108   : > { %1165 = vmatmul.mubr.f32.gmra.mrb[88].mxu0 %v2853_v30  ;;  %1908 = vmatmul.mubr.f32.gmra.mrb[88].mxu1 %v2745_v27 }
 0x109   : > { %1170 = vmatprep.mubr.f32.mxu0 %v2231_v0  ;;  %1910 = vmatprep.mubr.f32.mxu1 %v2765_v45 }
 0x10c   : > { %1171 = vmatmul.mubr.f32.gmra.mrb[90].mxu0 %v2860_v31  ;;  %1911 = vmatmul.mubr.f32.gmra.mrb[90].mxu1 %v2778_v61 }
 0x10d   : > { %1176 = vmatprep.mubr.f32.mxu0 %v2231_v0  ;;  %1913 = vmatprep.mubr.f32.mxu1 %v2791_v7 }
 0x110   : > { %1177 = vmatmul.mubr.f32.gmra.mrb[92].mxu0 %v2867_v32  ;;  %1914 = vmatmul.mubr.f32.gmra.mrb[92].mxu1 %v2804_v16 }
 0x111   : > { %1182 = vmatprep.mubr.f32.mxu0 %v2231_v0  ;;  %1916 = vmatprep.mubr.f32.mxu1 %v2811_v20 }
 0x114   : > { %1183 = vmatmul.mubr.f32.gmra.mrb[94].mxu0 %v2874_v35  ;;  %1917 = vmatmul.mubr.f32.gmra.mrb[94].mxu1 %v2818_v24 }
 0x115   : > { %1188 = vmatprep.mubr.f32.mxu0 %v2231_v0  ;;  %1919 = vmatprep.mubr.f32.mxu1 %v2825_v25 }
 0x118   : > { %1189 = vmatmul.mubr.f32.gmra.mrb[96].mxu0 %v2506_v51  ;;  %1920 = vmatmul.mubr.f32.gmra.mrb[96].mxu1 %v2832_v26 }
 0x119   : > { %1194 = vmatprep.mubr.f32.mxu0 %v2231_v0  ;;  %1922 = vmatprep.mubr.f32.mxu1 %v2839_v28 }
 0x11c   : > { %1195 = vmatmul.mubr.f32.gmra.mrb[98].mxu0 %v2532_v6  ;;  %1923 = vmatmul.mubr.f32.gmra.mrb[98].mxu1 %v2846_v29 }
 0x11d   : > { %1200 = vmatprep.mubr.f32.mxu0 %v2231_v0  ;;  %1925 = vmatprep.mubr.f32.mxu1 %v2853_v30 }
 0x120   : > { %1201 = vmatmul.mubr.f32.gmra.mrb[100].mxu0 %v2561_v23  ;;  %1926 = vmatmul.mubr.f32.gmra.mrb[100].mxu1 %v2860_v31 }
 0x121   : > { %1206 = vmatprep.mubr.f32.mxu0 %v2231_v0  ;;  %1928 = vmatprep.mubr.f32.mxu1 %v2867_v32 }
 0x124   : > { %1207 = vmatmul.mubr.f32.gmra.mrb[102].mxu0 %v2589_v40  ;;  %1929 = vmatmul.mubr.f32.gmra.mrb[102].mxu1 %v2874_v35 }
 0x125   : > { %1212 = vmatprep.mubr.f32.mxu0 %v2231_v0  ;;  %1931 = vmatprep.mubr.f32.mxu1 %v2506_v51 }
 0x128   : > { %1213 = vmatmul.mubr.f32.gmra.mrb[104].mxu0 %v2617_v59  ;;  %1932 = vmatmul.mubr.f32.gmra.mrb[104].mxu1 %v2532_v6 }
 0x129   : > { %1218 = vmatprep.mubr.f32.mxu0 %v2231_v0  ;;  %1934 = vmatprep.mubr.f32.mxu1 %v2561_v23 }
 0x12b   : > { %v532_v50 = vpop.f32.mrb[0].mxu0  ;;  %v676_v51 = vpop.f32.mrb[0].mxu1 }
 0x12c   : > { %1462 = vst [vmem:[%s2998_s20] sm:$0xff] %v532_v50  ;;  %1631 = vst [vmem:[%s2998_s20 + $0x540] sm:$0xff] %v676_v51  ;;  %v534_v5 = vpop.f32.mrb[1].mxu0  ;;  %v678_v6 = vpop.f32.mrb[1].mxu1  ;;  %1219 = vmatmul.mubr.f32.gmra.mrb[106].mxu0 %v2645_v15  ;;  %1935 = vmatmul.mubr.f32.gmra.mrb[106].mxu1 %v2589_v40 }
 0x12d   : > { %1463 = vst [vmem:[%s2998_s20 + $0x8] sm:$0xff] %v534_v5  ;;  %1632 = vst [vmem:[%s2998_s20 + $0x548] sm:$0xff] %v678_v6  ;;  %1224 = vmatprep.mubr.f32.mxu0 %v2231_v0  ;;  %1937 = vmatprep.mubr.f32.mxu1 %v2617_v59 }
 0x12f   : > { %v538_v22 = vpop.f32.mrb[2].mxu0  ;;  %v682_v23 = vpop.f32.mrb[2].mxu1 }
 0x130   : > { %1470 = vst [vmem:[%s2998_s20 + $0x38] sm:$0xff] %v538_v22  ;;  %1638 = vst [vmem:[%s2998_s20 + $0x578] sm:$0xff] %v682_v23  ;;  %v540_v39 = vpop.f32.mrb[3].mxu0  ;;  %v684_v58 = vpop.f32.mrb[3].mxu1  ;;  %1225 = vmatmul.mubr.f32.gmra.mrb[108].mxu0 %v2673_v34  ;;  %1938 = vmatmul.mubr.f32.gmra.mrb[108].mxu1 %v2645_v15 }
 0x131   : > { %1471 = vst [vmem:[%s2998_s20 + $0x40] sm:$0xff] %v540_v39  ;;  %1639 = vst [vmem:[%s2998_s20 + $0x580] sm:$0xff] %v684_v58  ;;  %1230 = vmatprep.mubr.f32.mxu0 %v2231_v0  ;;  %1940 = vmatprep.mubr.f32.mxu1 %v2673_v34 }
 0x133   : > { %v544_v40 = vpop.f32.mrb[4].mxu0  ;;  %v688_v59 = vpop.f32.mrb[4].mxu1 }
 0x134   : > { %1477 = vst [vmem:[%s2998_s20 + $0x70] sm:$0xff] %v544_v40  ;;  %1645 = vst [vmem:[%s2998_s20 + $0x5b0] sm:$0xff] %v688_v59  ;;  %v546_v14 = vpop.f32.mrb[5].mxu0  ;;  %v690_v33 = vpop.f32.mrb[5].mxu1  ;;  %1231 = vmatmul.mubr.f32.gmra.mrb[110].mxu0 %v2695_v53  ;;  %1941 = vmatmul.mubr.f32.gmra.mrb[110].mxu1 %v2695_v53 }
 0x135   : > { %1478 = vst [vmem:[%s2998_s20 + $0x78] sm:$0xff] %v546_v14  ;;  %1646 = vst [vmem:[%s2998_s20 + $0x5b8] sm:$0xff] %v690_v33 }
 0x137   : > { %v550_v0 = vpop.f32.mrb[6].mxu0  ;;  %v694_v15 = vpop.f32.mrb[6].mxu1 }
 0x138   : > { %1484 = vst [vmem:[%s2998_s20 + $0xa8] sm:$0xff] %v550_v0  ;;  %1652 = vst [vmem:[%s2998_s20 + $0x5e8] sm:$0xff] %v694_v15  ;;  %v552_v34 = vpop.f32.mrb[7].mxu0  ;;  %v696_v52 = vpop.f32.mrb[7].mxu1 }
 0x139   : > { %1485 = vst [vmem:[%s2998_s20 + $0xb0] sm:$0xff] %v552_v34  ;;  %1653 = vst [vmem:[%s2998_s20 + $0x5f0] sm:$0xff] %v696_v52 }
 0x13b   : > { %v556_v8 = vpop.f32.mrb[8].mxu0  ;;  %v700_v27 = vpop.f32.mrb[8].mxu1 }
 0x13c   : > { %1491 = vst [vmem:[%s2998_s20 + $0xe0] sm:$0xff] %v556_v8  ;;  %1659 = vst [vmem:[%s2998_s20 + $0x620] sm:$0xff] %v700_v27  ;;  %v558_v53 = vpop.f32.mrb[9].mxu0  ;;  %v702_v36 = vpop.f32.mrb[9].mxu1 }
 0x13d   : > { %1492 = vst [vmem:[%s2998_s20 + $0xe8] sm:$0xff] %v558_v53  ;;  %1660 = vst [vmem:[%s2998_s20 + $0x628] sm:$0xff] %v702_v36 }
 0x13f   : > { %v562_v37 = vpop.f32.mrb[10].mxu0  ;;  %v706_v38 = vpop.f32.mrb[10].mxu1 }
 0x140   : > { %1498 = vst [vmem:[%s2998_s20 + $0x118] sm:$0xff] %v562_v37  ;;  %1666 = vst [vmem:[%s2998_s20 + $0x658] sm:$0xff] %v706_v38  ;;  %v564_v41 = vpop.f32.mrb[11].mxu0  ;;  %v708_v42 = vpop.f32.mrb[11].mxu1 }
 0x141   : > { %1499 = vst [vmem:[%s2998_s20 + $0x120] sm:$0xff] %v564_v41  ;;  %1667 = vst [vmem:[%s2998_s20 + $0x660] sm:$0xff] %v708_v42 }
 0x143   : > { %v568_v43 = vpop.f32.mrb[12].mxu0  ;;  %v712_v44 = vpop.f32.mrb[12].mxu1 }
 0x144   : > { %1505 = vst [vmem:[%s2998_s20 + $0x150] sm:$0xff] %v568_v43  ;;  %1673 = vst [vmem:[%s2998_s20 + $0x690] sm:$0xff] %v712_v44  ;;  %v570_v45 = vpop.f32.mrb[13].mxu0  ;;  %v714_v46 = vpop.f32.mrb[13].mxu1 }
 0x145   : > { %1506 = vst [vmem:[%s2998_s20 + $0x158] sm:$0xff] %v570_v45  ;;  %1674 = vst [vmem:[%s2998_s20 + $0x698] sm:$0xff] %v714_v46 }
 0x147   : > { %v574_v47 = vpop.f32.mrb[14].mxu0  ;;  %v718_v48 = vpop.f32.mrb[14].mxu1 }
 0x148   : > { %1512 = vst [vmem:[%s2998_s20 + $0x188] sm:$0xff] %v574_v47  ;;  %1680 = vst [vmem:[%s2998_s20 + $0x6c8] sm:$0xff] %v718_v48  ;;  %v576_v49 = vpop.f32.mrb[15].mxu0  ;;  %v720_v54 = vpop.f32.mrb[15].mxu1 }
 0x149   : > { %1513 = vst [vmem:[%s2998_s20 + $0x190] sm:$0xff] %v576_v49  ;;  %1681 = vst [vmem:[%s2998_s20 + $0x6d0] sm:$0xff] %v720_v54 }
 0x14b   : > { %v580_v55 = vpop.f32.mrb[16].mxu0  ;;  %v789_v56 = vpop.f32.mrb[16].mxu1 }
 0x14c   : > { %1519 = vst [vmem:[%s2998_s20 + $0x1c0] sm:$0xff] %v580_v55  ;;  %1464 = vst [vmem:[%s2998_s20 + $0x10] sm:$0xff] %v789_v56  ;;  %v582_v57 = vpop.f32.mrb[17].mxu0  ;;  %v791_v60 = vpop.f32.mrb[17].mxu1 }
 0x14d   : > { %1520 = vst [vmem:[%s2998_s20 + $0x1c8] sm:$0xff] %v582_v57  ;;  %1465 = vst [vmem:[%s2998_s20 + $0x18] sm:$0xff] %v791_v60 }
 0x14f   : > { %v586_v61 = vpop.f32.mrb[18].mxu0  ;;  %v795_v62 = vpop.f32.mrb[18].mxu1 }
 0x150   : > { %1526 = vst [vmem:[%s2998_s20 + $0x1f8] sm:$0xff] %v586_v61  ;;  %1472 = vst [vmem:[%s2998_s20 + $0x48] sm:$0xff] %v795_v62  ;;  %v588_v63 = vpop.f32.mrb[19].mxu0  ;;  %v797_v1 = vpop.f32.mrb[19].mxu1 }
 0x151   : > { %1527 = vst [vmem:[%s2998_s20 + $0x200] sm:$0xff] %v588_v63  ;;  %1473 = vst [vmem:[%s2998_s20 + $0x50] sm:$0xff] %v797_v1 }
 0x153   : > { %v592_v2 = vpop.f32.mrb[20].mxu0  ;;  %v801_v3 = vpop.f32.mrb[20].mxu1 }
 0x154   : > { %1533 = vst [vmem:[%s2998_s20 + $0x230] sm:$0xff] %v592_v2  ;;  %1479 = vst [vmem:[%s2998_s20 + $0x80] sm:$0xff] %v801_v3  ;;  %v594_v4 = vpop.f32.mrb[21].mxu0  ;;  %v803_v7 = vpop.f32.mrb[21].mxu1 }
 0x155   : > { %1534 = vst [vmem:[%s2998_s20 + $0x238] sm:$0xff] %v594_v4  ;;  %1480 = vst [vmem:[%s2998_s20 + $0x88] sm:$0xff] %v803_v7 }
 0x157   : > { %v598_v9 = vpop.f32.mrb[22].mxu0  ;;  %v807_v10 = vpop.f32.mrb[22].mxu1 }
 0x158   : > { %1540 = vst [vmem:[%s2998_s20 + $0x268] sm:$0xff] %v598_v9  ;;  %1486 = vst [vmem:[%s2998_s20 + $0xb8] sm:$0xff] %v807_v10  ;;  %v600_v11 = vpop.f32.mrb[23].mxu0  ;;  %v809_v12 = vpop.f32.mrb[23].mxu1 }
 0x159   : > { %1541 = vst [vmem:[%s2998_s20 + $0x270] sm:$0xff] %v600_v11  ;;  %1487 = vst [vmem:[%s2998_s20 + $0xc0] sm:$0xff] %v809_v12 }
 0x15b   : > { %v604_v13 = vpop.f32.mrb[24].mxu0  ;;  %v813_v16 = vpop.f32.mrb[24].mxu1 }
 0x15c   : > { %1547 = vst [vmem:[%s2998_s20 + $0x2a0] sm:$0xff] %v604_v13  ;;  %1493 = vst [vmem:[%s2998_s20 + $0xf0] sm:$0xff] %v813_v16  ;;  %v606_v17 = vpop.f32.mrb[25].mxu0  ;;  %v815_v18 = vpop.f32.mrb[25].mxu1 }
 0x15d   : > { %1548 = vst [vmem:[%s2998_s20 + $0x2a8] sm:$0xff] %v606_v17  ;;  %1494 = vst [vmem:[%s2998_s20 + $0xf8] sm:$0xff] %v815_v18 }
 0x15f   : > { %v610_v19 = vpop.f32.mrb[26].mxu0  ;;  %v819_v20 = vpop.f32.mrb[26].mxu1 }
 0x160   : > { %1554 = vst [vmem:[%s2998_s20 + $0x2d8] sm:$0xff] %v610_v19  ;;  %1500 = vst [vmem:[%s2998_s20 + $0x128] sm:$0xff] %v819_v20  ;;  %v612_v21 = vpop.f32.mrb[27].mxu0  ;;  %v821_v24 = vpop.f32.mrb[27].mxu1 }
 0x161   : > { %1555 = vst [vmem:[%s2998_s20 + $0x2e0] sm:$0xff] %v612_v21  ;;  %1501 = vst [vmem:[%s2998_s20 + $0x130] sm:$0xff] %v821_v24 }
 0x163   : > { %v616_v25 = vpop.f32.mrb[28].mxu0  ;;  %v825_v26 = vpop.f32.mrb[28].mxu1 }
 0x164   : > { %1561 = vst [vmem:[%s2998_s20 + $0x310] sm:$0xff] %v616_v25  ;;  %1507 = vst [vmem:[%s2998_s20 + $0x160] sm:$0xff] %v825_v26  ;;  %v618_v28 = vpop.f32.mrb[29].mxu0  ;;  %v827_v29 = vpop.f32.mrb[29].mxu1 }
 0x165   : > { %1562 = vst [vmem:[%s2998_s20 + $0x318] sm:$0xff] %v618_v28  ;;  %1508 = vst [vmem:[%s2998_s20 + $0x168] sm:$0xff] %v827_v29 }
 0x167   : > { %v622_v30 = vpop.f32.mrb[30].mxu0  ;;  %v831_v31 = vpop.f32.mrb[30].mxu1 }
 0x168   : > { %1568 = vst [vmem:[%s2998_s20 + $0x348] sm:$0xff] %v622_v30  ;;  %1514 = vst [vmem:[%s2998_s20 + $0x198] sm:$0xff] %v831_v31  ;;  %v624_v32 = vpop.f32.mrb[31].mxu0  ;;  %v833_v35 = vpop.f32.mrb[31].mxu1 }
 0x169   : > { %1569 = vst [vmem:[%s2998_s20 + $0x350] sm:$0xff] %v624_v32  ;;  %1515 = vst [vmem:[%s2998_s20 + $0x1a0] sm:$0xff] %v833_v35 }
 0x16b   : > { %v628_v50 = vpop.f32.mrb[32].mxu0  ;;  %v837_v51 = vpop.f32.mrb[32].mxu1 }
 0x16c   : > { %1575 = vst [vmem:[%s2998_s20 + $0x380] sm:$0xff] %v628_v50  ;;  %1521 = vst [vmem:[%s2998_s20 + $0x1d0] sm:$0xff] %v837_v51  ;;  %v630_v5 = vpop.f32.mrb[33].mxu0  ;;  %v839_v6 = vpop.f32.mrb[33].mxu1 }
 0x16d   : > { %1576 = vst [vmem:[%s2998_s20 + $0x388] sm:$0xff] %v630_v5  ;;  %1522 = vst [vmem:[%s2998_s20 + $0x1d8] sm:$0xff] %v839_v6 }
 0x16f   : > { %v634_v22 = vpop.f32.mrb[34].mxu0  ;;  %v843_v23 = vpop.f32.mrb[34].mxu1 }
 0x170   : > { %1582 = vst [vmem:[%s2998_s20 + $0x3b8] sm:$0xff] %v634_v22  ;;  %1528 = vst [vmem:[%s2998_s20 + $0x208] sm:$0xff] %v843_v23  ;;  %v636_v39 = vpop.f32.mrb[35].mxu0  ;;  %v845_v58 = vpop.f32.mrb[35].mxu1 }
 0x171   : > { %1583 = vst [vmem:[%s2998_s20 + $0x3c0] sm:$0xff] %v636_v39  ;;  %1529 = vst [vmem:[%s2998_s20 + $0x210] sm:$0xff] %v845_v58 }
 0x173   : > { %v640_v40 = vpop.f32.mrb[36].mxu0  ;;  %v849_v59 = vpop.f32.mrb[36].mxu1 }
 0x174   : > { %1589 = vst [vmem:[%s2998_s20 + $0x3f0] sm:$0xff] %v640_v40  ;;  %1535 = vst [vmem:[%s2998_s20 + $0x240] sm:$0xff] %v849_v59  ;;  %v642_v14 = vpop.f32.mrb[37].mxu0  ;;  %v851_v33 = vpop.f32.mrb[37].mxu1 }
 0x175   : > { %1590 = vst [vmem:[%s2998_s20 + $0x3f8] sm:$0xff] %v642_v14  ;;  %1536 = vst [vmem:[%s2998_s20 + $0x248] sm:$0xff] %v851_v33 }
 0x177   : > { %v646_v0 = vpop.f32.mrb[38].mxu0  ;;  %v855_v15 = vpop.f32.mrb[38].mxu1 }
 0x178   : > { %1596 = vst [vmem:[%s2998_s20 + $0x428] sm:$0xff] %v646_v0  ;;  %1542 = vst [vmem:[%s2998_s20 + $0x278] sm:$0xff] %v855_v15  ;;  %v648_v34 = vpop.f32.mrb[39].mxu0  ;;  %v857_v52 = vpop.f32.mrb[39].mxu1 }
 0x179   : > { %1597 = vst [vmem:[%s2998_s20 + $0x430] sm:$0xff] %v648_v34  ;;  %1543 = vst [vmem:[%s2998_s20 + $0x280] sm:$0xff] %v857_v52 }
 0x17b   : > { %v652_v8 = vpop.f32.mrb[40].mxu0  ;;  %v861_v27 = vpop.f32.mrb[40].mxu1 }
 0x17c   : > { %1603 = vst [vmem:[%s2998_s20 + $0x460] sm:$0xff] %v652_v8  ;;  %1549 = vst [vmem:[%s2998_s20 + $0x2b0] sm:$0xff] %v861_v27  ;;  %v654_v53 = vpop.f32.mrb[41].mxu0  ;;  %v863_v36 = vpop.f32.mrb[41].mxu1 }
 0x17d   : > { %1604 = vst [vmem:[%s2998_s20 + $0x468] sm:$0xff] %v654_v53  ;;  %1550 = vst [vmem:[%s2998_s20 + $0x2b8] sm:$0xff] %v863_v36 }
 0x17f   : > { %v658_v37 = vpop.f32.mrb[42].mxu0  ;;  %v867_v38 = vpop.f32.mrb[42].mxu1 }
 0x180   : > { %1610 = vst [vmem:[%s2998_s20 + $0x498] sm:$0xff] %v658_v37  ;;  %1556 = vst [vmem:[%s2998_s20 + $0x2e8] sm:$0xff] %v867_v38  ;;  %v660_v41 = vpop.f32.mrb[43].mxu0  ;;  %v869_v42 = vpop.f32.mrb[43].mxu1 }
 0x181   : > { %1611 = vst [vmem:[%s2998_s20 + $0x4a0] sm:$0xff] %v660_v41  ;;  %1557 = vst [vmem:[%s2998_s20 + $0x2f0] sm:$0xff] %v869_v42 }
 0x183   : > { %v664_v43 = vpop.f32.mrb[44].mxu0  ;;  %v873_v44 = vpop.f32.mrb[44].mxu1 }
 0x184   : > { %1617 = vst [vmem:[%s2998_s20 + $0x4d0] sm:$0xff] %v664_v43  ;;  %1563 = vst [vmem:[%s2998_s20 + $0x320] sm:$0xff] %v873_v44  ;;  %v666_v45 = vpop.f32.mrb[45].mxu0  ;;  %v875_v46 = vpop.f32.mrb[45].mxu1 }
 0x185   : > { %1618 = vst [vmem:[%s2998_s20 + $0x4d8] sm:$0xff] %v666_v45  ;;  %1564 = vst [vmem:[%s2998_s20 + $0x328] sm:$0xff] %v875_v46 }
 0x187   : > { %v670_v47 = vpop.f32.mrb[46].mxu0  ;;  %v879_v48 = vpop.f32.mrb[46].mxu1 }
 0x188   : > { %1624 = vst [vmem:[%s2998_s20 + $0x508] sm:$0xff] %v670_v47  ;;  %1570 = vst [vmem:[%s2998_s20 + $0x358] sm:$0xff] %v879_v48  ;;  %v672_v49 = vpop.f32.mrb[47].mxu0  ;;  %v881_v54 = vpop.f32.mrb[47].mxu1 }
 0x189   : > { %1625 = vst [vmem:[%s2998_s20 + $0x510] sm:$0xff] %v672_v49  ;;  %1571 = vst [vmem:[%s2998_s20 + $0x360] sm:$0xff] %v881_v54 }
 0x18b   : > { %v885_v55 = vpop.f32.mrb[48].mxu1  ;;  %v1046_v56 = vpop.f32.mrb[48].mxu0 }
 0x18c   : > { %1577 = vst [vmem:[%s2998_s20 + $0x390] sm:$0xff] %v885_v55  ;;  %1466 = vst [vmem:[%s2998_s20 + $0x20] sm:$0xff] %v1046_v56  ;;  %v887_v57 = vpop.f32.mrb[49].mxu1  ;;  %v1048_v60 = vpop.f32.mrb[49].mxu0 }
 0x18d   : > { %1578 = vst [vmem:[%s2998_s20 + $0x398] sm:$0xff] %v887_v57  ;;  %1467 = vst [vmem:[%s2998_s20 + $0x28] sm:$0xff] %v1048_v60 }
 0x18f   : > { %v891_v61 = vpop.f32.mrb[50].mxu1  ;;  %v1052_v62 = vpop.f32.mrb[50].mxu0 }
 0x190   : > { %1584 = vst [vmem:[%s2998_s20 + $0x3c8] sm:$0xff] %v891_v61  ;;  %1474 = vst [vmem:[%s2998_s20 + $0x58] sm:$0xff] %v1052_v62  ;;  %v893_v63 = vpop.f32.mrb[51].mxu1  ;;  %v1054_v1 = vpop.f32.mrb[51].mxu0 }
 0x191   : > { %1585 = vst [vmem:[%s2998_s20 + $0x3d0] sm:$0xff] %v893_v63  ;;  %1475 = vst [vmem:[%s2998_s20 + $0x60] sm:$0xff] %v1054_v1 }
 0x193   : > { %v897_v2 = vpop.f32.mrb[52].mxu1  ;;  %v1058_v3 = vpop.f32.mrb[52].mxu0 }
 0x194   : > { %1591 = vst [vmem:[%s2998_s20 + $0x400] sm:$0xff] %v897_v2  ;;  %1481 = vst [vmem:[%s2998_s20 + $0x90] sm:$0xff] %v1058_v3  ;;  %v899_v4 = vpop.f32.mrb[53].mxu1  ;;  %v1060_v7 = vpop.f32.mrb[53].mxu0 }
 0x195   : > { %1592 = vst [vmem:[%s2998_s20 + $0x408] sm:$0xff] %v899_v4  ;;  %1482 = vst [vmem:[%s2998_s20 + $0x98] sm:$0xff] %v1060_v7 }
 0x197   : > { %v903_v9 = vpop.f32.mrb[54].mxu1  ;;  %v1064_v10 = vpop.f32.mrb[54].mxu0 }
 0x198   : > { %1598 = vst [vmem:[%s2998_s20 + $0x438] sm:$0xff] %v903_v9  ;;  %1488 = vst [vmem:[%s2998_s20 + $0xc8] sm:$0xff] %v1064_v10  ;;  %v905_v11 = vpop.f32.mrb[55].mxu1  ;;  %v1066_v12 = vpop.f32.mrb[55].mxu0 }
 0x199   : > { %1599 = vst [vmem:[%s2998_s20 + $0x440] sm:$0xff] %v905_v11  ;;  %1489 = vst [vmem:[%s2998_s20 + $0xd0] sm:$0xff] %v1066_v12 }
 0x19b   : > { %v909_v13 = vpop.f32.mrb[56].mxu1  ;;  %v1070_v16 = vpop.f32.mrb[56].mxu0 }
 0x19c   : > { %1605 = vst [vmem:[%s2998_s20 + $0x470] sm:$0xff] %v909_v13  ;;  %1495 = vst [vmem:[%s2998_s20 + $0x100] sm:$0xff] %v1070_v16  ;;  %v911_v17 = vpop.f32.mrb[57].mxu1  ;;  %v1072_v18 = vpop.f32.mrb[57].mxu0 }
 0x19d   : > { %1606 = vst [vmem:[%s2998_s20 + $0x478] sm:$0xff] %v911_v17  ;;  %1496 = vst [vmem:[%s2998_s20 + $0x108] sm:$0xff] %v1072_v18 }
 0x19f   : > { %v915_v19 = vpop.f32.mrb[58].mxu1  ;;  %v1076_v20 = vpop.f32.mrb[58].mxu0 }
 0x1a0   : > { %1612 = vst [vmem:[%s2998_s20 + $0x4a8] sm:$0xff] %v915_v19  ;;  %1502 = vst [vmem:[%s2998_s20 + $0x138] sm:$0xff] %v1076_v20  ;;  %v917_v21 = vpop.f32.mrb[59].mxu1  ;;  %v1078_v24 = vpop.f32.mrb[59].mxu0 }
 0x1a1   : > { %1613 = vst [vmem:[%s2998_s20 + $0x4b0] sm:$0xff] %v917_v21  ;;  %1503 = vst [vmem:[%s2998_s20 + $0x140] sm:$0xff] %v1078_v24 }
 0x1a3   : > { %v921_v25 = vpop.f32.mrb[60].mxu1  ;;  %v1082_v26 = vpop.f32.mrb[60].mxu0 }
 0x1a4   : > { %1619 = vst [vmem:[%s2998_s20 + $0x4e0] sm:$0xff] %v921_v25  ;;  %1509 = vst [vmem:[%s2998_s20 + $0x170] sm:$0xff] %v1082_v26  ;;  %v923_v28 = vpop.f32.mrb[61].mxu1  ;;  %v1084_v29 = vpop.f32.mrb[61].mxu0 }
 0x1a5   : > { %1620 = vst [vmem:[%s2998_s20 + $0x4e8] sm:$0xff] %v923_v28  ;;  %1510 = vst [vmem:[%s2998_s20 + $0x178] sm:$0xff] %v1084_v29 }
 0x1a7   : > { %v927_v30 = vpop.f32.mrb[62].mxu1  ;;  %v1088_v31 = vpop.f32.mrb[62].mxu0 }
 0x1a8   : > { %1626 = vst [vmem:[%s2998_s20 + $0x518] sm:$0xff] %v927_v30  ;;  %1516 = vst [vmem:[%s2998_s20 + $0x1a8] sm:$0xff] %v1088_v31  ;;  %v929_v32 = vpop.f32.mrb[63].mxu1  ;;  %v1090_v35 = vpop.f32.mrb[63].mxu0 }
 0x1a9   : > { %1627 = vst [vmem:[%s2998_s20 + $0x520] sm:$0xff] %v929_v32  ;;  %1517 = vst [vmem:[%s2998_s20 + $0x1b0] sm:$0xff] %v1090_v35 }
 0x1ab   : > { %v933_v50 = vpop.f32.mrb[64].mxu1  ;;  %v1094_v51 = vpop.f32.mrb[64].mxu0 }
 0x1ac   : > { %1633 = vst [vmem:[%s2998_s20 + $0x550] sm:$0xff] %v933_v50  ;;  %1523 = vst [vmem:[%s2998_s20 + $0x1e0] sm:$0xff] %v1094_v51  ;;  %v935_v5 = vpop.f32.mrb[65].mxu1  ;;  %v1096_v6 = vpop.f32.mrb[65].mxu0 }
 0x1ad   : > { %1634 = vst [vmem:[%s2998_s20 + $0x558] sm:$0xff] %v935_v5  ;;  %1524 = vst [vmem:[%s2998_s20 + $0x1e8] sm:$0xff] %v1096_v6 }
 0x1af   : > { %v939_v22 = vpop.f32.mrb[66].mxu1  ;;  %v1100_v23 = vpop.f32.mrb[66].mxu0 }
 0x1b0   : > { %1640 = vst [vmem:[%s2998_s20 + $0x588] sm:$0xff] %v939_v22  ;;  %1530 = vst [vmem:[%s2998_s20 + $0x218] sm:$0xff] %v1100_v23  ;;  %v941_v39 = vpop.f32.mrb[67].mxu1  ;;  %v1102_v58 = vpop.f32.mrb[67].mxu0 }
 0x1b1   : > { %1641 = vst [vmem:[%s2998_s20 + $0x590] sm:$0xff] %v941_v39  ;;  %1531 = vst [vmem:[%s2998_s20 + $0x220] sm:$0xff] %v1102_v58 }
 0x1b3   : > { %v945_v40 = vpop.f32.mrb[68].mxu1  ;;  %v1106_v59 = vpop.f32.mrb[68].mxu0 }
 0x1b4   : > { %1647 = vst [vmem:[%s2998_s20 + $0x5c0] sm:$0xff] %v945_v40  ;;  %1537 = vst [vmem:[%s2998_s20 + $0x250] sm:$0xff] %v1106_v59  ;;  %v947_v14 = vpop.f32.mrb[69].mxu1  ;;  %v1108_v33 = vpop.f32.mrb[69].mxu0 }
 0x1b5   : > { %1648 = vst [vmem:[%s2998_s20 + $0x5c8] sm:$0xff] %v947_v14  ;;  %1538 = vst [vmem:[%s2998_s20 + $0x258] sm:$0xff] %v1108_v33 }
 0x1b7   : > { %v951_v0 = vpop.f32.mrb[70].mxu1  ;;  %v1112_v15 = vpop.f32.mrb[70].mxu0 }
 0x1b8   : > { %1654 = vst [vmem:[%s2998_s20 + $0x5f8] sm:$0xff] %v951_v0  ;;  %1544 = vst [vmem:[%s2998_s20 + $0x288] sm:$0xff] %v1112_v15  ;;  %v953_v34 = vpop.f32.mrb[71].mxu1  ;;  %v1114_v52 = vpop.f32.mrb[71].mxu0 }
 0x1b9   : > { %1655 = vst [vmem:[%s2998_s20 + $0x600] sm:$0xff] %v953_v34  ;;  %1545 = vst [vmem:[%s2998_s20 + $0x290] sm:$0xff] %v1114_v52 }
 0x1bb   : > { %v957_v8 = vpop.f32.mrb[72].mxu1  ;;  %v1118_v27 = vpop.f32.mrb[72].mxu0 }
 0x1bc   : > { %1661 = vst [vmem:[%s2998_s20 + $0x630] sm:$0xff] %v957_v8  ;;  %1551 = vst [vmem:[%s2998_s20 + $0x2c0] sm:$0xff] %v1118_v27  ;;  %v959_v53 = vpop.f32.mrb[73].mxu1  ;;  %v1120_v36 = vpop.f32.mrb[73].mxu0 }
 0x1bd   : > { %1662 = vst [vmem:[%s2998_s20 + $0x638] sm:$0xff] %v959_v53  ;;  %1552 = vst [vmem:[%s2998_s20 + $0x2c8] sm:$0xff] %v1120_v36 }
 0x1bf   : > { %v963_v37 = vpop.f32.mrb[74].mxu1  ;;  %v1124_v38 = vpop.f32.mrb[74].mxu0 }
 0x1c0   : > { %1668 = vst [vmem:[%s2998_s20 + $0x668] sm:$0xff] %v963_v37  ;;  %1558 = vst [vmem:[%s2998_s20 + $0x2f8] sm:$0xff] %v1124_v38  ;;  %v965_v41 = vpop.f32.mrb[75].mxu1  ;;  %v1126_v42 = vpop.f32.mrb[75].mxu0 }
 0x1c1   : > { %1669 = vst [vmem:[%s2998_s20 + $0x670] sm:$0xff] %v965_v41  ;;  %1559 = vst [vmem:[%s2998_s20 + $0x300] sm:$0xff] %v1126_v42 }
 0x1c3   : > { %v969_v43 = vpop.f32.mrb[76].mxu1  ;;  %v1130_v44 = vpop.f32.mrb[76].mxu0 }
 0x1c4   : > { %1675 = vst [vmem:[%s2998_s20 + $0x6a0] sm:$0xff] %v969_v43  ;;  %1565 = vst [vmem:[%s2998_s20 + $0x330] sm:$0xff] %v1130_v44  ;;  %v971_v45 = vpop.f32.mrb[77].mxu1  ;;  %v1132_v46 = vpop.f32.mrb[77].mxu0 }
 0x1c5   : > { %1676 = vst [vmem:[%s2998_s20 + $0x6a8] sm:$0xff] %v971_v45  ;;  %1566 = vst [vmem:[%s2998_s20 + $0x338] sm:$0xff] %v1132_v46 }
 0x1c7   : > { %v975_v47 = vpop.f32.mrb[78].mxu1  ;;  %v1136_v48 = vpop.f32.mrb[78].mxu0 }
 0x1c8   : > { %1682 = vst [vmem:[%s2998_s20 + $0x6d8] sm:$0xff] %v975_v47  ;;  %1572 = vst [vmem:[%s2998_s20 + $0x368] sm:$0xff] %v1136_v48  ;;  %v977_v49 = vpop.f32.mrb[79].mxu1  ;;  %v1138_v54 = vpop.f32.mrb[79].mxu0 }
 0x1c9   : > { %1683 = vst [vmem:[%s2998_s20 + $0x6e0] sm:$0xff] %v977_v49  ;;  %1573 = vst [vmem:[%s2998_s20 + $0x370] sm:$0xff] %v1138_v54 }
 0x1cb   : > { %v1142_v55 = vpop.f32.mrb[80].mxu0  ;;  %v1897_v56 = vpop.f32.mrb[80].mxu1 }
 0x1cc   : > { %1579 = vst [vmem:[%s2998_s20 + $0x3a0] sm:$0xff] %v1142_v55  ;;  %1476 = vst.msk [vmem:[%s2998_s20 + $0x68] sm:$0xff] %vm1468_vm0, %v1897_v56  ;;  %v1144_v57 = vpop.f32.mrb[81].mxu0  ;;  %v1303_v60 = vpop.f32.mrb[81].mxu1 }
 0x1cd   : > { %1580 = vst [vmem:[%s2998_s20 + $0x3a8] sm:$0xff] %v1144_v57  ;;  %1469 = vst.msk [vmem:[%s2998_s20 + $0x30] sm:$0xff] %vm1468_vm0, %v1303_v60 }
 0x1cf   : > { %v1148_v61 = vpop.f32.mrb[82].mxu0  ;;  %v1900_v62 = vpop.f32.mrb[82].mxu1 }
 0x1d0   : > { %1586 = vst [vmem:[%s2998_s20 + $0x3d8] sm:$0xff] %v1148_v61  ;;  %1490 = vst.msk [vmem:[%s2998_s20 + $0xd8] sm:$0xff] %vm1468_vm0, %v1900_v62  ;;  %v1150_v63 = vpop.f32.mrb[83].mxu0  ;;  %v1313_v1 = vpop.f32.mrb[83].mxu1 }
 0x1d1   : > { %1587 = vst [vmem:[%s2998_s20 + $0x3e0] sm:$0xff] %v1150_v63  ;;  %1483 = vst.msk [vmem:[%s2998_s20 + $0xa0] sm:$0xff] %vm1468_vm0, %v1313_v1 }
 0x1d3   : > { %v1154_v2 = vpop.f32.mrb[84].mxu0  ;;  %v1903_v3 = vpop.f32.mrb[84].mxu1 }
 0x1d4   : > { %1593 = vst [vmem:[%s2998_s20 + $0x410] sm:$0xff] %v1154_v2  ;;  %1504 = vst.msk [vmem:[%s2998_s20 + $0x148] sm:$0xff] %vm1468_vm0, %v1903_v3  ;;  %v1156_v4 = vpop.f32.mrb[85].mxu0  ;;  %v1323_v7 = vpop.f32.mrb[85].mxu1 }
 0x1d5   : > { %1594 = vst [vmem:[%s2998_s20 + $0x418] sm:$0xff] %v1156_v4  ;;  %1497 = vst.msk [vmem:[%s2998_s20 + $0x110] sm:$0xff] %vm1468_vm0, %v1323_v7 }
 0x1d7   : > { %v1160_v9 = vpop.f32.mrb[86].mxu0  ;;  %v1906_v10 = vpop.f32.mrb[86].mxu1 }
 0x1d8   : > { %1600 = vst [vmem:[%s2998_s20 + $0x448] sm:$0xff] %v1160_v9  ;;  %1518 = vst.msk [vmem:[%s2998_s20 + $0x1b8] sm:$0xff] %vm1468_vm0, %v1906_v10  ;;  %v1162_v11 = vpop.f32.mrb[87].mxu0  ;;  %v1333_v12 = vpop.f32.mrb[87].mxu1 }
 0x1d9   : > { %1601 = vst [vmem:[%s2998_s20 + $0x450] sm:$0xff] %v1162_v11  ;;  %1511 = vst.msk [vmem:[%s2998_s20 + $0x180] sm:$0xff] %vm1468_vm0, %v1333_v12 }
 0x1db   : > { %v1166_v13 = vpop.f32.mrb[88].mxu0  ;;  %v1909_v16 = vpop.f32.mrb[88].mxu1 }
 0x1dc   : > { %1607 = vst [vmem:[%s2998_s20 + $0x480] sm:$0xff] %v1166_v13  ;;  %1532 = vst.msk [vmem:[%s2998_s20 + $0x228] sm:$0xff] %vm1468_vm0, %v1909_v16  ;;  %v1168_v17 = vpop.f32.mrb[89].mxu0  ;;  %v1343_v18 = vpop.f32.mrb[89].mxu1 }
 0x1dd   : > { %1608 = vst [vmem:[%s2998_s20 + $0x488] sm:$0xff] %v1168_v17  ;;  %1525 = vst.msk [vmem:[%s2998_s20 + $0x1f0] sm:$0xff] %vm1468_vm0, %v1343_v18 }
 0x1df   : > { %v1172_v19 = vpop.f32.mrb[90].mxu0  ;;  %v1912_v20 = vpop.f32.mrb[90].mxu1 }
 0x1e0   : > { %1614 = vst [vmem:[%s2998_s20 + $0x4b8] sm:$0xff] %v1172_v19  ;;  %1546 = vst.msk [vmem:[%s2998_s20 + $0x298] sm:$0xff] %vm1468_vm0, %v1912_v20  ;;  %v1174_v21 = vpop.f32.mrb[91].mxu0  ;;  %v1353_v24 = vpop.f32.mrb[91].mxu1 }
 0x1e1   : > { %1615 = vst [vmem:[%s2998_s20 + $0x4c0] sm:$0xff] %v1174_v21  ;;  %1539 = vst.msk [vmem:[%s2998_s20 + $0x260] sm:$0xff] %vm1468_vm0, %v1353_v24 }
 0x1e3   : > { %v1178_v25 = vpop.f32.mrb[92].mxu0  ;;  %v1915_v26 = vpop.f32.mrb[92].mxu1 }
 0x1e4   : > { %1621 = vst [vmem:[%s2998_s20 + $0x4f0] sm:$0xff] %v1178_v25  ;;  %1560 = vst.msk [vmem:[%s2998_s20 + $0x308] sm:$0xff] %vm1468_vm0, %v1915_v26  ;;  %v1180_v28 = vpop.f32.mrb[93].mxu0  ;;  %v1363_v29 = vpop.f32.mrb[93].mxu1 }
 0x1e5   : > { %1622 = vst [vmem:[%s2998_s20 + $0x4f8] sm:$0xff] %v1180_v28  ;;  %1553 = vst.msk [vmem:[%s2998_s20 + $0x2d0] sm:$0xff] %vm1468_vm0, %v1363_v29 }
 0x1e7   : > { %v1184_v30 = vpop.f32.mrb[94].mxu0  ;;  %v1918_v31 = vpop.f32.mrb[94].mxu1 }
 0x1e8   : > { %1628 = vst [vmem:[%s2998_s20 + $0x528] sm:$0xff] %v1184_v30  ;;  %1574 = vst.msk [vmem:[%s2998_s20 + $0x378] sm:$0xff] %vm1468_vm0, %v1918_v31  ;;  %v1186_v32 = vpop.f32.mrb[95].mxu0  ;;  %v1373_v35 = vpop.f32.mrb[95].mxu1 }
 0x1e9   : > { %1629 = vst [vmem:[%s2998_s20 + $0x530] sm:$0xff] %v1186_v32  ;;  %1567 = vst.msk [vmem:[%s2998_s20 + $0x340] sm:$0xff] %vm1468_vm0, %v1373_v35 }
 0x1eb   : > { %v1190_v50 = vpop.f32.mrb[96].mxu0  ;;  %v1921_v51 = vpop.f32.mrb[96].mxu1 }
 0x1ec   : > { %1635 = vst [vmem:[%s2998_s20 + $0x560] sm:$0xff] %v1190_v50  ;;  %1588 = vst.msk [vmem:[%s2998_s20 + $0x3e8] sm:$0xff] %vm1468_vm0, %v1921_v51  ;;  %v1192_v5 = vpop.f32.mrb[97].mxu0  ;;  %v1383_v6 = vpop.f32.mrb[97].mxu1 }
 0x1ed   : > { %1636 = vst [vmem:[%s2998_s20 + $0x568] sm:$0xff] %v1192_v5  ;;  %1581 = vst.msk [vmem:[%s2998_s20 + $0x3b0] sm:$0xff] %vm1468_vm0, %v1383_v6 }
 0x1ef   : > { %v1196_v22 = vpop.f32.mrb[98].mxu0  ;;  %v1924_v23 = vpop.f32.mrb[98].mxu1 }
 0x1f0   : > { %1642 = vst [vmem:[%s2998_s20 + $0x598] sm:$0xff] %v1196_v22  ;;  %1602 = vst.msk [vmem:[%s2998_s20 + $0x458] sm:$0xff] %vm1468_vm0, %v1924_v23  ;;  %v1198_v39 = vpop.f32.mrb[99].mxu0  ;;  %v1393_v58 = vpop.f32.mrb[99].mxu1 }
 0x1f1   : > { %1643 = vst [vmem:[%s2998_s20 + $0x5a0] sm:$0xff] %v1198_v39  ;;  %1595 = vst.msk [vmem:[%s2998_s20 + $0x420] sm:$0xff] %vm1468_vm0, %v1393_v58 }
 0x1f3   : > { %v1202_v40 = vpop.f32.mrb[100].mxu0  ;;  %v1927_v59 = vpop.f32.mrb[100].mxu1 }
 0x1f4   : > { %1649 = vst [vmem:[%s2998_s20 + $0x5d0] sm:$0xff] %v1202_v40  ;;  %1616 = vst.msk [vmem:[%s2998_s20 + $0x4c8] sm:$0xff] %vm1468_vm0, %v1927_v59  ;;  %v1204_v14 = vpop.f32.mrb[101].mxu0  ;;  %v1403_v33 = vpop.f32.mrb[101].mxu1 }
 0x1f5   : > { %1650 = vst [vmem:[%s2998_s20 + $0x5d8] sm:$0xff] %v1204_v14  ;;  %1609 = vst.msk [vmem:[%s2998_s20 + $0x490] sm:$0xff] %vm1468_vm0, %v1403_v33 }
 0x1f7   : > { %v1208_v0 = vpop.f32.mrb[102].mxu0  ;;  %v1930_v15 = vpop.f32.mrb[102].mxu1 }
 0x1f8   : > { %1656 = vst [vmem:[%s2998_s20 + $0x608] sm:$0xff] %v1208_v0  ;;  %1630 = vst.msk [vmem:[%s2998_s20 + $0x538] sm:$0xff] %vm1468_vm0, %v1930_v15  ;;  %v1210_v34 = vpop.f32.mrb[103].mxu0  ;;  %v1413_v52 = vpop.f32.mrb[103].mxu1 }
 0x1f9   : > { %1657 = vst [vmem:[%s2998_s20 + $0x610] sm:$0xff] %v1210_v34  ;;  %1623 = vst.msk [vmem:[%s2998_s20 + $0x500] sm:$0xff] %vm1468_vm0, %v1413_v52 }
 0x1fb   : > { %v1214_v8 = vpop.f32.mrb[104].mxu0  ;;  %v1933_v27 = vpop.f32.mrb[104].mxu1 }
 0x1fc   : > { %1663 = vst [vmem:[%s2998_s20 + $0x640] sm:$0xff] %v1214_v8  ;;  %1644 = vst.msk [vmem:[%s2998_s20 + $0x5a8] sm:$0xff] %vm1468_vm0, %v1933_v27  ;;  %v1216_v53 = vpop.f32.mrb[105].mxu0  ;;  %v1423_v36 = vpop.f32.mrb[105].mxu1 }
 0x1fd   : > { %1664 = vst [vmem:[%s2998_s20 + $0x648] sm:$0xff] %v1216_v53  ;;  %1637 = vst.msk [vmem:[%s2998_s20 + $0x570] sm:$0xff] %vm1468_vm0, %v1423_v36 }
 0x1ff   : > { %v1220_v37 = vpop.f32.mrb[106].mxu0  ;;  %v1936_v38 = vpop.f32.mrb[106].mxu1 }
 0x200   : > { %1670 = vst [vmem:[%s2998_s20 + $0x678] sm:$0xff] %v1220_v37  ;;  %1658 = vst.msk [vmem:[%s2998_s20 + $0x618] sm:$0xff] %vm1468_vm0, %v1936_v38  ;;  %v1222_v41 = vpop.f32.mrb[107].mxu0  ;;  %v1433_v42 = vpop.f32.mrb[107].mxu1 }
 0x201   : > { %1671 = vst [vmem:[%s2998_s20 + $0x680] sm:$0xff] %v1222_v41  ;;  %1651 = vst.msk [vmem:[%s2998_s20 + $0x5e0] sm:$0xff] %vm1468_vm0, %v1433_v42 }
 0x203   : > { %v1226_v43 = vpop.f32.mrb[108].mxu0  ;;  %v1939_v44 = vpop.f32.mrb[108].mxu1 }
 0x204   : > { %1677 = vst [vmem:[%s2998_s20 + $0x6b0] sm:$0xff] %v1226_v43  ;;  %1672 = vst.msk [vmem:[%s2998_s20 + $0x688] sm:$0xff] %vm1468_vm0, %v1939_v44  ;;  %v1228_v45 = vpop.f32.mrb[109].mxu0  ;;  %v1443_v46 = vpop.f32.mrb[109].mxu1 }
 0x205   : > { %1678 = vst [vmem:[%s2998_s20 + $0x6b8] sm:$0xff] %v1228_v45  ;;  %1665 = vst.msk [vmem:[%s2998_s20 + $0x650] sm:$0xff] %vm1468_vm0, %v1443_v46 }
 0x207   : > { %v1232_v47 = vpop.f32.mrb[110].mxu0  ;;  %v1942_v48 = vpop.f32.mrb[110].mxu1 }
 0x208   : > { %1684 = vst [vmem:[%s2998_s20 + $0x6e8] sm:$0xff] %v1232_v47  ;;  %1686 = vst.msk [vmem:[%s2998_s20 + $0x6f8] sm:$0xff] %vm1468_vm0, %v1942_v48  ;;  %v1234_v49 = vpop.f32.mrb[111].mxu0  ;;  %v1453_v54 = vpop.f32.mrb[111].mxu1 }
 0x209   : > { %1685 = vst [vmem:[%s2998_s20 + $0x6f0] sm:$0xff] %v1234_v49  ;;  %1679 = vst.msk [vmem:[%s2998_s20 + $0x6c0] sm:$0xff] %vm1468_vm0, %v1453_v54 }
 0x20a PF: > { %s15_s14 = sadd.s32 1, %s2226_s14   ;;  %s3292_s9 = smov %s2210_s10 }
 0x20b   : > { %p12_p9 = scmp.ge.s32.totalorder %s15_s14, 4   ;;  %s3293_s10 = smov %s2214_s11 }
 0x20c   : > { %s3294_s11 = smov %s2296_s21  ;;  %s3295_s12 = smov %s2222_s13 }
 0x20d   : > { %s3296_s13 = smov %s3298_s16  ;;  %14 = sbr.rel (!%p12_p9) target bundleno = 4 (0x4), region = 71 }
 0x214   :  { %1719 = vsyncpa [#allocation3], 1 }
 0x215   :  { %1721 = vsyncpa [#allocation3 + $0x1], 1 }

</bundles_post_ra>
